<compile_context>
chip_gen: v5e
topology: v5e:2x2
jax: 0.10.0
libtpu: 0.0.40
codegen_flags: <defaults>
</compile_context>

<pallas_src>
import jax
import jax.numpy as jnp
from jax.experimental import pallas as pl
from jax.experimental.pallas import tpu as pltpu

LANE = 128  # TPU lane width; all GEMM N / channel dims are padded to this.


def _round_up(x, m):
    return (x + m - 1) // m * m


# ----------------------------- Pallas kernels ------------------------------

def _conv_gemm_pool_kernel(a_ref, w_ref, b_ref, o_ref):
    """Fused conv-as-GEMM + 2x2 max-pool + bias + ReLU on one row tile.

    a: (4, tm, K) im2col rows, leading dim = pool-window position, bf16.
    w: (K, 128)   conv weights, output channels zero-padded to 128 lanes, bf16.
    b: (1, 128)   bias (zero-padded), f32.
    o: (tm, 128)  pooled, ReLU'd activations, channels in lanes (lane-dense), bf16.
    """
    w = w_ref[...]
    r = jnp.dot(a_ref[0], w, preferred_element_type=jnp.float32)
    r = jnp.maximum(r, jnp.dot(a_ref[1], w, preferred_element_type=jnp.float32))
    r = jnp.maximum(r, jnp.dot(a_ref[2], w, preferred_element_type=jnp.float32))
    r = jnp.maximum(r, jnp.dot(a_ref[3], w, preferred_element_type=jnp.float32))
    o_ref[...] = jnp.maximum(r + b_ref[...], 0.0).astype(o_ref.dtype)


def _fc_stack_kernel(x_ref, w1_ref, b1_ref, w2_ref, b2_ref, w3_ref, b3_ref, o_ref):
    """Fused fc1(+ReLU) -> fc2(+ReLU) -> fc3 on one row tile (bf16 MXU, f32 acc)."""
    h = jnp.dot(x_ref[...], w1_ref[...], preferred_element_type=jnp.float32)
    h = jnp.maximum(h + b1_ref[...], 0.0).astype(w2_ref.dtype)
    h = jnp.dot(h, w2_ref[...], preferred_element_type=jnp.float32)
    h = jnp.maximum(h + b2_ref[...], 0.0).astype(w3_ref.dtype)
    o_ref[...] = jnp.dot(h, w3_ref[...], preferred_element_type=jnp.float32) + b3_ref[...]


# ------------------------------ kernel wrappers -----------------------------

def conv_relu_pool_pallas(a, w, b, block_m=512):
    """a: (4, M, K) im2col (M = B*pooled pixels) -> (M, 128) pooled activations."""
    _, M, K = a.shape
    mp = _round_up(M, 16)                 # bf16 sublane-safe row padding
    if mp <= block_m:
        block_m = mp                      # small batch: one block covers all rows
    else:
        mp = _round_up(M, block_m)        # large batch: row tiles, pipeline + megacore
    if mp != M:
        a = jnp.pad(a, ((0, 0), (0, mp - M), (0, 0)))
    out = pl.pallas_call(
        _conv_gemm_pool_kernel,
        out_shape=jax.ShapeDtypeStruct((mp, LANE), jnp.bfloat16),
        grid=(mp // block_m,),
        in_specs=[pl.BlockSpec((4, block_m, K), lambda i: (0, i, 0)),
                  pl.BlockSpec((K, LANE), lambda i: (0, 0)),
                  pl.BlockSpec((1, LANE), lambda i: (0, 0))],
        out_specs=pl.BlockSpec((block_m, LANE), lambda i: (i, 0)),
        compiler_params=pltpu.CompilerParams(dimension_semantics=("parallel",)),
    )(a, w, b)
    return out[:M]


def fc_stack_pallas(x, w1, b1, w2, b2, w3, b3, block_m=512):
    """relu(relu(x@w1+b1)@w2+b2)@w3+b3 with 128-lane padded weights; returns (M, 10) f32."""
    M, K = x.shape
    mp = _round_up(M, 16)
    if mp <= block_m:
        block_m = mp
    else:
        mp = _round_up(M, block_m)
    if mp != M:
        x = jnp.pad(x, ((0, mp - M), (0, 0)))
    out = pl.pallas_call(
        _fc_stack_kernel,
        out_shape=jax.ShapeDtypeStruct((mp, LANE), jnp.float32),
        grid=(mp // block_m,),
        in_specs=[pl.BlockSpec((block_m, K), lambda i: (i, 0)),
                  pl.BlockSpec(w1.shape, lambda i: (0, 0)),
                  pl.BlockSpec((1, LANE), lambda i: (0, 0)),
                  pl.BlockSpec(w2.shape, lambda i: (0, 0)),
                  pl.BlockSpec((1, LANE), lambda i: (0, 0)),
                  pl.BlockSpec(w3.shape, lambda i: (0, 0)),
                  pl.BlockSpec((1, LANE), lambda i: (0, 0))],
        out_specs=pl.BlockSpec((block_m, LANE), lambda i: (i, 0)),
        compiler_params=pltpu.CompilerParams(dimension_semantics=("parallel",)),
    )(x, w1, b1, w2, b2, w3, b3)
    return out[:M, :10]


# ----------------------------- XLA-side glue --------------------------------

def _im2col_pooled(x, k):
    """x: (B, H, W, C) NHWC. Returns (4, B*Hp*Wp, k*k*C): leading dim is the 2x2
    pool-window position; rows ordered (b, ho, wo); feature order (dy, dx, c),
    matching the repacked conv weights."""
    B, H, W, C = x.shape
    Ho, Wo = H - k + 1, W - k + 1
    Hp, Wp = Ho // 2, Wo // 2
    mats = []
    for py in range(2):
        for px in range(2):
            cols = []
            for dy in range(k):
                for dx in range(k):
                    ys, xs = py + dy, px + dx
                    cols.append(x[:, ys:ys + 2 * Hp - 1:2, xs:xs + 2 * Wp - 1:2, :])
            a = jnp.stack(cols, axis=3)                   # (B, Hp, Wp, k*k, C)
            mats.append(a.reshape(B * Hp * Wp, k * k * C))
    return jnp.stack(mats, axis=0)                        # (4, B*P, k*k*C)


# ------------------------------ parameters ----------------------------------

def init_params(key):
    ks = jax.random.split(key, 10)
    s = 0.05
    return {
        "conv1_w": jax.random.normal(ks[0], (6, 3, 5, 5), jnp.float32) * s,
        "conv1_b": jax.random.normal(ks[1], (6,), jnp.float32) * s,
        "conv2_w": jax.random.normal(ks[2], (16, 6, 5, 5), jnp.float32) * s,
        "conv2_b": jax.random.normal(ks[3], (16,), jnp.float32) * s,
        "fc1_w": jax.random.normal(ks[4], (120, 400), jnp.float32) * s,
        "fc1_b": jax.random.normal(ks[5], (120,), jnp.float32) * s,
        "fc2_w": jax.random.normal(ks[6], (84, 120), jnp.float32) * s,
        "fc2_b": jax.random.normal(ks[7], (84,), jnp.float32) * s,
        "fc3_w": jax.random.normal(ks[8], (10, 84), jnp.float32) * s,
        "fc3_b": jax.random.normal(ks[9], (10,), jnp.float32) * s,
    }


def prepare_params(p):
    """One-time weight repack: every reshape/transpose/pad/cast hoisted out of forward."""
    def conv_w(w, b):
        O, C, k, _ = w.shape
        m = jnp.transpose(w, (2, 3, 1, 0)).reshape(k * k * C, O)   # rows (dy, dx, c)
        m = jnp.pad(m, ((0, 0), (0, LANE - O)))                    # lanes only; no K pad
        bb = jnp.pad(b, (0, LANE - O)).reshape(1, LANE)
        return m.astype(jnp.bfloat16), bb.astype(jnp.float32)

    w1c, b1c = conv_w(p["conv1_w"], p["conv1_b"])   # (75, 128)
    w2c, b2c = conv_w(p["conv2_w"], p["conv2_b"])   # (150, 128)

    # fc1: torch flatten order is (c, h, w); our activation flatten is (h, w, c) with
    # the 16 real channels (K compacted to 400 — no 16->128 channel padding).
    f1 = p["fc1_w"].reshape(120, 16, 5, 5).transpose(2, 3, 1, 0).reshape(400, 120)
    f1 = jnp.pad(f1, ((0, 0), (0, LANE - 120))).astype(jnp.bfloat16)       # (400, 128)
    fb1 = jnp.pad(p["fc1_b"], (0, LANE - 120)).reshape(1, LANE).astype(jnp.float32)
    f2 = jnp.pad(p["fc2_w"].T, ((0, LANE - 120), (0, LANE - 84))).astype(jnp.bfloat16)
    fb2 = jnp.pad(p["fc2_b"], (0, LANE - 84)).reshape(1, LANE).astype(jnp.float32)
    f3 = jnp.pad(p["fc3_w"].T, ((0, LANE - 84), (0, LANE - 10))).astype(jnp.bfloat16)
    fb3 = jnp.pad(p["fc3_b"], (0, LANE - 10)).reshape(1, LANE).astype(jnp.float32)

    return dict(w1c=w1c, b1c=b1c, w2c=w2c, b2c=b2c,
                fw1=f1, fb1=fb1, fw2=f2, fb2=fb2, fw3=f3, fb3=fb3)


# ------------------------------- forward pass --------------------------------

@jax.jit
def net_forward(x_nchw, q):
    """x_nchw: (B, 3, 32, 32) float32 -> logits (B, 10) f32. Matches PyTorch Net.forward."""
    B = x_nchw.shape[0]
    x = jnp.transpose(x_nchw, (0, 2, 3, 1)).astype(jnp.bfloat16)   # NHWC once, bf16

    # conv1 + ReLU + 2x2 maxpool (one fused, batch-flattened pallas_call)
    a1 = _im2col_pooled(x, 5)                         # (4, B*196, 75)
    y = conv_relu_pool_pallas(a1, q["w1c"], q["b1c"])  # (B*196, 128) -> 14x14 map
    y = y.reshape(B, 14, 14, LANE)[..., :6]           # real channels, NHWC

    # conv2 + ReLU + 2x2 maxpool (one fused, batch-flattened pallas_call)
    a2 = _im2col_pooled(y, 5)                         # (4, B*25, 150)
    z = conv_relu_pool_pallas(a2, q["w2c"], q["b2c"])  # (B*25, 128)  -> 5x5 map
    z = z.reshape(B, 5, 5, LANE)[..., :16]            # (B, 5, 5, 16) real channels

    # fused fc1 -> fc2 -> fc3 (one pallas_call); flatten is (h, w, c) order with
    # K=400, which fw1 was permuted for at init (keeps PyTorch .view semantics).
    flat = z.reshape(B, 400)
    return fc_stack_pallas(flat, q["fw1"], q["fb1"],
                           q["fw2"], q["fb2"], q["fw3"], q["fb3"])   # (B, 10) f32


if __name__ == "__main__":
    key = jax.random.PRNGKey(0)
    k_x, k_p = jax.random.split(key)
    # Input must be 32x32 so the flatten is 16*5*5, as the module implies.
    x = jax.random.normal(k_x, (2, 3, 32, 32), jnp.float32)
    params = init_params(k_p)
    prepared = prepare_params(params)       # weight repack, done once outside the hot path
    out = net_forward(x, prepared)
    out = jax.block_until_ready(out)
    assert out.shape == (2, 10) and out.dtype == jnp.float32
    print("KERNEL_OK")
</pallas_src>

<mosaic_0001>
module attributes {stable_mosaic.version = 11 : i64} {
  func.func @_conv_gemm_pool_kernel(%arg0: i32, %arg1: memref<4x400x75xbf16, #tpu.memory_space<vmem>>, %arg2: memref<75x128xbf16, #tpu.memory_space<vmem>>, %arg3: memref<1x128xf32, #tpu.memory_space<vmem>>, %arg4: memref<400x128xbf16, #tpu.memory_space<vmem>>) attributes {dimension_semantics = [#tpu.dimension_semantics<parallel>], iteration_bounds = array<i64: 1>, scalar_prefetch = 0 : i64, scratch_operands = 0 : i64, tpu.core_type = #tpu.core_type<tc>, window_params = [{transform_indices = @transform_0, window_bounds = array<i64: 4, 400, 75>}, {pipeline_mode = #tpu.pipeline_mode<synchronous>, transform_indices = @transform_1, window_bounds = array<i64: 75, 128>}, {pipeline_mode = #tpu.pipeline_mode<synchronous>, transform_indices = @transform_2, window_bounds = array<i64: 1, 128>}, {transform_indices = @transform_3, window_bounds = array<i64: 400, 128>}]} {
    %c0 = arith.constant 0 : index
    %c0_0 = arith.constant 0 : index
    %0 = vector.load %arg2[%c0, %c0_0] : memref<75x128xbf16, #tpu.memory_space<vmem>>, vector<75x128xbf16>
    %c0_1 = arith.constant 0 : index
    %c0_2 = arith.constant 0 : index
    %c0_3 = arith.constant 0 : index
    %1 = vector.load %arg1[%c0_1, %c0_2, %c0_3] : memref<4x400x75xbf16, #tpu.memory_space<vmem>>, vector<1x400x75xbf16>
    %2 = vector.shape_cast %1 : vector<1x400x75xbf16> to vector<400x75xbf16>
    %cst = arith.constant dense<0.000000e+00> : vector<400x128xf32>
    %3 = tpu.matmul %2, %0, %cst {dimension_numbers = #tpu.dot_dimension_numbers<[1], [0], [0], [1], [0, 0, 1, 1], [], []>} : vector<400x75xbf16>, vector<75x128xbf16>, vector<400x128xf32> -> vector<400x128xf32>
    %c1 = arith.constant 1 : index
    %c0_4 = arith.constant 0 : index
    %c0_5 = arith.constant 0 : index
    %4 = vector.load %arg1[%c1, %c0_4, %c0_5] : memref<4x400x75xbf16, #tpu.memory_space<vmem>>, vector<1x400x75xbf16>
    %5 = vector.shape_cast %4 : vector<1x400x75xbf16> to vector<400x75xbf16>
    %cst_6 = arith.constant dense<0.000000e+00> : vector<400x128xf32>
    %6 = tpu.matmul %5, %0, %cst_6 {dimension_numbers = #tpu.dot_dimension_numbers<[1], [0], [0], [1], [0, 0, 1, 1], [], []>} : vector<400x75xbf16>, vector<75x128xbf16>, vector<400x128xf32> -> vector<400x128xf32>
    %7 = arith.maximumf %3, %6 : vector<400x128xf32>
    %c2 = arith.constant 2 : index
    %c0_7 = arith.constant 0 : index
    %c0_8 = arith.constant 0 : index
    %8 = vector.load %arg1[%c2, %c0_7, %c0_8] : memref<4x400x75xbf16, #tpu.memory_space<vmem>>, vector<1x400x75xbf16>
    %9 = vector.shape_cast %8 : vector<1x400x75xbf16> to vector<400x75xbf16>
    %cst_9 = arith.constant dense<0.000000e+00> : vector<400x128xf32>
    %10 = tpu.matmul %9, %0, %cst_9 {dimension_numbers = #tpu.dot_dimension_numbers<[1], [0], [0], [1], [0, 0, 1, 1], [], []>} : vector<400x75xbf16>, vector<75x128xbf16>, vector<400x128xf32> -> vector<400x128xf32>
    %11 = arith.maximumf %7, %10 : vector<400x128xf32>
    %c3 = arith.constant 3 : index
    %c0_10 = arith.constant 0 : index
    %c0_11 = arith.constant 0 : index
    %12 = vector.load %arg1[%c3, %c0_10, %c0_11] : memref<4x400x75xbf16, #tpu.memory_space<vmem>>, vector<1x400x75xbf16>
    %13 = vector.shape_cast %12 : vector<1x400x75xbf16> to vector<400x75xbf16>
    %cst_12 = arith.constant dense<0.000000e+00> : vector<400x128xf32>
    %14 = tpu.matmul %13, %0, %cst_12 {dimension_numbers = #tpu.dot_dimension_numbers<[1], [0], [0], [1], [0, 0, 1, 1], [], []>} : vector<400x75xbf16>, vector<75x128xbf16>, vector<400x128xf32> -> vector<400x128xf32>
    %15 = arith.maximumf %11, %14 : vector<400x128xf32>
    %c0_13 = arith.constant 0 : index
    %c0_14 = arith.constant 0 : index
    %16 = vector.load %arg3[%c0_13, %c0_14] : memref<1x128xf32, #tpu.memory_space<vmem>>, vector<1x128xf32>
    %17 = vector.broadcast %16 : vector<1x128xf32> to vector<400x128xf32>
    %18 = arith.addf %15, %17 : vector<400x128xf32>
    %cst_15 = arith.constant 0.000000e+00 : f32
    %19 = vector.broadcast %cst_15 : f32 to vector<400x128xf32>
    %20 = arith.maximumf %18, %19 : vector<400x128xf32>
    %21 = arith.truncf %20 : vector<400x128xf32> to vector<400x128xbf16>
    %c0_16 = arith.constant 0 : index
    %c0_17 = arith.constant 0 : index
    %22 = vector.load %arg4[%c0_16, %c0_17] : memref<400x128xbf16, #tpu.memory_space<vmem>>, vector<400x128xbf16>
    tpu.vector_store %arg4[%c0_16, %c0_17], %21 {strides = array<i32>} : memref<400x128xbf16, #tpu.memory_space<vmem>>, vector<400x128xbf16>,
    return
  }
  func.func @transform_0(%arg0: i32) -> (i32, i32, i32) {
    %c0_i32 = arith.constant 0 : i32
    %c0_i32_0 = arith.constant 0 : i32
    %c0_i32_1 = arith.constant 0 : i32
    return %c0_i32, %arg0, %c0_i32_0 : i32, i32, i32
  }
  func.func @transform_1(%arg0: i32) -> (i32, i32) {
    %c0_i32 = arith.constant 0 : i32
    %c0_i32_0 = arith.constant 0 : i32
    %c0_i32_1 = arith.constant 0 : i32
    return %c0_i32, %c0_i32_0 : i32, i32
  }
  func.func @transform_2(%arg0: i32) -> (i32, i32) {
    %c0_i32 = arith.constant 0 : i32
    %c0_i32_0 = arith.constant 0 : i32
    %c0_i32_1 = arith.constant 0 : i32
    return %c0_i32, %c0_i32_0 : i32, i32
  }
  func.func @transform_3(%arg0: i32) -> (i32, i32) {
    %c0_i32 = arith.constant 0 : i32
    %c0_i32_0 = arith.constant 0 : i32
    return %arg0, %c0_i32 : i32, i32
  }
}

module attributes {stable_mosaic.version = 11 : i64} {
  func.func @_conv_gemm_pool_kernel(%arg0: i32, %arg1: memref<4x64x150xbf16, #tpu.memory_space<vmem>>, %arg2: memref<150x128xbf16, #tpu.memory_space<vmem>>, %arg3: memref<1x128xf32, #tpu.memory_space<vmem>>, %arg4: memref<64x128xbf16, #tpu.memory_space<vmem>>) attributes {dimension_semantics = [#tpu.dimension_semantics<parallel>], iteration_bounds = array<i64: 1>, scalar_prefetch = 0 : i64, scratch_operands = 0 : i64, tpu.core_type = #tpu.core_type<tc>, window_params = [{transform_indices = @transform_0, window_bounds = array<i64: 4, 64, 150>}, {pipeline_mode = #tpu.pipeline_mode<synchronous>, transform_indices = @transform_1, window_bounds = array<i64: 150, 128>}, {pipeline_mode = #tpu.pipeline_mode<synchronous>, transform_indices = @transform_2, window_bounds = array<i64: 1, 128>}, {transform_indices = @transform_3, window_bounds = array<i64: 64, 128>}]} {
    %c0 = arith.constant 0 : index
    %c0_0 = arith.constant 0 : index
    %0 = vector.load %arg2[%c0, %c0_0] : memref<150x128xbf16, #tpu.memory_space<vmem>>, vector<150x128xbf16>
    %c0_1 = arith.constant 0 : index
    %c0_2 = arith.constant 0 : index
    %c0_3 = arith.constant 0 : index
    %1 = vector.load %arg1[%c0_1, %c0_2, %c0_3] : memref<4x64x150xbf16, #tpu.memory_space<vmem>>, vector<1x64x150xbf16>
    %2 = vector.shape_cast %1 : vector<1x64x150xbf16> to vector<64x150xbf16>
    %cst = arith.constant dense<0.000000e+00> : vector<64x128xf32>
    %3 = tpu.matmul %2, %0, %cst {dimension_numbers = #tpu.dot_dimension_numbers<[1], [0], [0], [1], [0, 0, 1, 1], [], []>} : vector<64x150xbf16>, vector<150x128xbf16>, vector<64x128xf32> -> vector<64x128xf32>
    %c1 = arith.constant 1 : index
    %c0_4 = arith.constant 0 : index
    %c0_5 = arith.constant 0 : index
    %4 = vector.load %arg1[%c1, %c0_4, %c0_5] : memref<4x64x150xbf16, #tpu.memory_space<vmem>>, vector<1x64x150xbf16>
    %5 = vector.shape_cast %4 : vector<1x64x150xbf16> to vector<64x150xbf16>
    %cst_6 = arith.constant dense<0.000000e+00> : vector<64x128xf32>
    %6 = tpu.matmul %5, %0, %cst_6 {dimension_numbers = #tpu.dot_dimension_numbers<[1], [0], [0], [1], [0, 0, 1, 1], [], []>} : vector<64x150xbf16>, vector<150x128xbf16>, vector<64x128xf32> -> vector<64x128xf32>
    %7 = arith.maximumf %3, %6 : vector<64x128xf32>
    %c2 = arith.constant 2 : index
    %c0_7 = arith.constant 0 : index
    %c0_8 = arith.constant 0 : index
    %8 = vector.load %arg1[%c2, %c0_7, %c0_8] : memref<4x64x150xbf16, #tpu.memory_space<vmem>>, vector<1x64x150xbf16>
    %9 = vector.shape_cast %8 : vector<1x64x150xbf16> to vector<64x150xbf16>
    %cst_9 = arith.constant dense<0.000000e+00> : vector<64x128xf32>
    %10 = tpu.matmul %9, %0, %cst_9 {dimension_numbers = #tpu.dot_dimension_numbers<[1], [0], [0], [1], [0, 0, 1, 1], [], []>} : vector<64x150xbf16>, vector<150x128xbf16>, vector<64x128xf32> -> vector<64x128xf32>
    %11 = arith.maximumf %7, %10 : vector<64x128xf32>
    %c3 = arith.constant 3 : index
    %c0_10 = arith.constant 0 : index
    %c0_11 = arith.constant 0 : index
    %12 = vector.load %arg1[%c3, %c0_10, %c0_11] : memref<4x64x150xbf16, #tpu.memory_space<vmem>>, vector<1x64x150xbf16>
    %13 = vector.shape_cast %12 : vector<1x64x150xbf16> to vector<64x150xbf16>
    %cst_12 = arith.constant dense<0.000000e+00> : vector<64x128xf32>
    %14 = tpu.matmul %13, %0, %cst_12 {dimension_numbers = #tpu.dot_dimension_numbers<[1], [0], [0], [1], [0, 0, 1, 1], [], []>} : vector<64x150xbf16>, vector<150x128xbf16>, vector<64x128xf32> -> vector<64x128xf32>
    %15 = arith.maximumf %11, %14 : vector<64x128xf32>
    %c0_13 = arith.constant 0 : index
    %c0_14 = arith.constant 0 : index
    %16 = vector.load %arg3[%c0_13, %c0_14] : memref<1x128xf32, #tpu.memory_space<vmem>>, vector<1x128xf32>
    %17 = vector.broadcast %16 : vector<1x128xf32> to vector<64x128xf32>
    %18 = arith.addf %15, %17 : vector<64x128xf32>
    %cst_15 = arith.constant 0.000000e+00 : f32
    %19 = vector.broadcast %cst_15 : f32 to vector<64x128xf32>
    %20 = arith.maximumf %18, %19 : vector<64x128xf32>
    %21 = arith.truncf %20 : vector<64x128xf32> to vector<64x128xbf16>
    %c0_16 = arith.constant 0 : index
    %c0_17 = arith.constant 0 : index
    %22 = vector.load %arg4[%c0_16, %c0_17] : memref<64x128xbf16, #tpu.memory_space<vmem>>, vector<64x128xbf16>
    tpu.vector_store %arg4[%c0_16, %c0_17], %21 {strides = array<i32>} : memref<64x128xbf16, #tpu.memory_space<vmem>>, vector<64x128xbf16>,
    return
  }
  func.func @transform_0(%arg0: i32) -> (i32, i32, i32) {
    %c0_i32 = arith.constant 0 : i32
    %c0_i32_0 = arith.constant 0 : i32
    %c0_i32_1 = arith.constant 0 : i32
    return %c0_i32, %arg0, %c0_i32_0 : i32, i32, i32
  }
  func.func @transform_1(%arg0: i32) -> (i32, i32) {
    %c0_i32 = arith.constant 0 : i32
    %c0_i32_0 = arith.constant 0 : i32
    %c0_i32_1 = arith.constant 0 : i32
    return %c0_i32, %c0_i32_0 : i32, i32
  }
  func.func @transform_2(%arg0: i32) -> (i32, i32) {
    %c0_i32 = arith.constant 0 : i32
    %c0_i32_0 = arith.constant 0 : i32
    %c0_i32_1 = arith.constant 0 : i32
    return %c0_i32, %c0_i32_0 : i32, i32
  }
  func.func @transform_3(%arg0: i32) -> (i32, i32) {
    %c0_i32 = arith.constant 0 : i32
    %c0_i32_0 = arith.constant 0 : i32
    return %arg0, %c0_i32 : i32, i32
  }
}

module attributes {stable_mosaic.version = 11 : i64} {
  func.func @_fc_stack_kernel(%arg0: i32, %arg1: memref<16x400xbf16, #tpu.memory_space<vmem>>, %arg2: memref<400x128xbf16, #tpu.memory_space<vmem>>, %arg3: memref<1x128xf32, #tpu.memory_space<vmem>>, %arg4: memref<128x128xbf16, #tpu.memory_space<vmem>>, %arg5: memref<1x128xf32, #tpu.memory_space<vmem>>, %arg6: memref<128x128xbf16, #tpu.memory_space<vmem>>, %arg7: memref<1x128xf32, #tpu.memory_space<vmem>>, %arg8: memref<16x128xf32, #tpu.memory_space<vmem>>) attributes {dimension_semantics = [#tpu.dimension_semantics<parallel>], iteration_bounds = array<i64: 1>, scalar_prefetch = 0 : i64, scratch_operands = 0 : i64, tpu.core_type = #tpu.core_type<tc>, window_params = [{transform_indices = @transform_0, window_bounds = array<i64: 16, 400>}, {pipeline_mode = #tpu.pipeline_mode<synchronous>, transform_indices = @transform_1, window_bounds = array<i64: 400, 128>}, {pipeline_mode = #tpu.pipeline_mode<synchronous>, transform_indices = @transform_2, window_bounds = array<i64: 1, 128>}, {pipeline_mode = #tpu.pipeline_mode<synchronous>, transform_indices = @transform_3, window_bounds = array<i64: 128, 128>}, {pipeline_mode = #tpu.pipeline_mode<synchronous>, transform_indices = @transform_4, window_bounds = array<i64: 1, 128>}, {pipeline_mode = #tpu.pipeline_mode<synchronous>, transform_indices = @transform_5, window_bounds = array<i64: 128, 128>}, {pipeline_mode = #tpu.pipeline_mode<synchronous>, transform_indices = @transform_6, window_bounds = array<i64: 1, 128>}, {transform_indices = @transform_7, window_bounds = array<i64: 16, 128>}]} {
    %c0 = arith.constant 0 : index
    %c0_0 = arith.constant 0 : index
    %0 = vector.load %arg1[%c0, %c0_0] : memref<16x400xbf16, #tpu.memory_space<vmem>>, vector<16x400xbf16>
    %c0_1 = arith.constant 0 : index
    %c0_2 = arith.constant 0 : index
    %1 = vector.load %arg2[%c0_1, %c0_2] : memref<400x128xbf16, #tpu.memory_space<vmem>>, vector<400x128xbf16>
    %cst = arith.constant dense<0.000000e+00> : vector<16x128xf32>
    %2 = tpu.matmul %0, %1, %cst {dimension_numbers = #tpu.dot_dimension_numbers<[1], [0], [0], [1], [0, 0, 1, 1], [], []>} : vector<16x400xbf16>, vector<400x128xbf16>, vector<16x128xf32> -> vector<16x128xf32>
    %c0_3 = arith.constant 0 : index
    %c0_4 = arith.constant 0 : index
    %3 = vector.load %arg3[%c0_3, %c0_4] : memref<1x128xf32, #tpu.memory_space<vmem>>, vector<1x128xf32>
    %4 = vector.broadcast %3 : vector<1x128xf32> to vector<16x128xf32>
    %5 = arith.addf %2, %4 : vector<16x128xf32>
    %cst_5 = arith.constant 0.000000e+00 : f32
    %6 = vector.broadcast %cst_5 : f32 to vector<16x128xf32>
    %7 = arith.maximumf %5, %6 : vector<16x128xf32>
    %8 = arith.truncf %7 : vector<16x128xf32> to vector<16x128xbf16>
    %c0_6 = arith.constant 0 : index
    %c0_7 = arith.constant 0 : index
    %9 = vector.load %arg4[%c0_6, %c0_7] : memref<128x128xbf16, #tpu.memory_space<vmem>>, vector<128x128xbf16>
    %cst_8 = arith.constant dense<0.000000e+00> : vector<16x128xf32>
    %10 = tpu.matmul %8, %9, %cst_8 {dimension_numbers = #tpu.dot_dimension_numbers<[1], [0], [0], [1], [0, 0, 1, 1], [], []>} : vector<16x128xbf16>, vector<128x128xbf16>, vector<16x128xf32> -> vector<16x128xf32>
    %c0_9 = arith.constant 0 : index
    %c0_10 = arith.constant 0 : index
    %11 = vector.load %arg5[%c0_9, %c0_10] : memref<1x128xf32, #tpu.memory_space<vmem>>, vector<1x128xf32>
    %12 = vector.broadcast %11 : vector<1x128xf32> to vector<16x128xf32>
    %13 = arith.addf %10, %12 : vector<16x128xf32>
    %cst_11 = arith.constant 0.000000e+00 : f32
    %14 = vector.broadcast %cst_11 : f32 to vector<16x128xf32>
    %15 = arith.maximumf %13, %14 : vector<16x128xf32>
    %16 = arith.truncf %15 : vector<16x128xf32> to vector<16x128xbf16>
    %c0_12 = arith.constant 0 : index
    %c0_13 = arith.constant 0 : index
    %17 = vector.load %arg6[%c0_12, %c0_13] : memref<128x128xbf16, #tpu.memory_space<vmem>>, vector<128x128xbf16>
    %cst_14 = arith.constant dense<0.000000e+00> : vector<16x128xf32>
    %18 = tpu.matmul %16, %17, %cst_14 {dimension_numbers = #tpu.dot_dimension_numbers<[1], [0], [0], [1], [0, 0, 1, 1], [], []>} : vector<16x128xbf16>, vector<128x128xbf16>, vector<16x128xf32> -> vector<16x128xf32>
    %c0_15 = arith.constant 0 : index
    %c0_16 = arith.constant 0 : index
    %19 = vector.load %arg7[%c0_15, %c0_16] : memref<1x128xf32, #tpu.memory_space<vmem>>, vector<1x128xf32>
    %20 = vector.broadcast %19 : vector<1x128xf32> to vector<16x128xf32>
    %21 = arith.addf %18, %20 : vector<16x128xf32>
    %c0_17 = arith.constant 0 : index
    %c0_18 = arith.constant 0 : index
    %22 = vector.load %arg8[%c0_17, %c0_18] : memref<16x128xf32, #tpu.memory_space<vmem>>, vector<16x128xf32>
    tpu.vector_store %arg8[%c0_17, %c0_18], %21 {strides = array<i32>} : memref<16x128xf32, #tpu.memory_space<vmem>>, vector<16x128xf32>,
    return
  }
  func.func @transform_0(%arg0: i32) -> (i32, i32) {
    %c0_i32 = arith.constant 0 : i32
    %c0_i32_0 = arith.constant 0 : i32
    return %arg0, %c0_i32 : i32, i32
  }
  func.func @transform_1(%arg0: i32) -> (i32, i32) {
    %c0_i32 = arith.constant 0 : i32
    %c0_i32_0 = arith.constant 0 : i32
    %c0_i32_1 = arith.constant 0 : i32
    return %c0_i32, %c0_i32_0 : i32, i32
  }
  func.func @transform_2(%arg0: i32) -> (i32, i32) {
    %c0_i32 = arith.constant 0 : i32
    %c0_i32_0 = arith.constant 0 : i32
    %c0_i32_1 = arith.constant 0 : i32
    return %c0_i32, %c0_i32_0 : i32, i32
  }
  func.func @transform_3(%arg0: i32) -> (i32, i32) {
    %c0_i32 = arith.constant 0 : i32
    %c0_i32_0 = arith.constant 0 : i32
    %c0_i32_1 = arith.constant 0 : i32
    return %c0_i32, %c0_i32_0 : i32, i32
  }
  func.func @transform_4(%arg0: i32) -> (i32, i32) {
    %c0_i32 = arith.constant 0 : i32
    %c0_i32_0 = arith.constant 0 : i32
    %c0_i32_1 = arith.constant 0 : i32
    return %c0_i32, %c0_i32_0 : i32, i32
  }
  func.func @transform_5(%arg0: i32) -> (i32, i32) {
    %c0_i32 = arith.constant 0 : i32
    %c0_i32_0 = arith.constant 0 : i32
    %c0_i32_1 = arith.constant 0 : i32
    return %c0_i32, %c0_i32_0 : i32, i32
  }
  func.func @transform_6(%arg0: i32) -> (i32, i32) {
    %c0_i32 = arith.constant 0 : i32
    %c0_i32_0 = arith.constant 0 : i32
    %c0_i32_1 = arith.constant 0 : i32
    return %c0_i32, %c0_i32_0 : i32, i32
  }
  func.func @transform_7(%arg0: i32) -> (i32, i32) {
    %c0_i32 = arith.constant 0 : i32
    %c0_i32_0 = arith.constant 0 : i32
    return %arg0, %c0_i32 : i32, i32
  }
}

</mosaic_0001>

<bundles_post_ra>
// kernel: net_forward.3
= control target key start
LH: loop header
LB: loop body
LE: loop exit
PB: predicated region body
PF: predicated region fallthrough
CT: control target
= control target key end

     0   :  { %vm305_vm0 = vcmask 1044480   ;;  %vm306_vm1 = vcmask 1045504   ;;  %v2886_v2 = vmov 65535   ;;  %vm229_vm2 = vcmask 613376   ;;  %s3460_s1 = inlined_call_operand.vmem [shape: bf16[75,128], index: 1, kind: input, shape index: {}]   ;;  %s3461_s0 = inlined_call_operand.vmem [shape: bf16[4,400,75], index: 0, kind: input, shape index: {}]   ;;  %s3462_s2 = inlined_call_operand.vmem [shape: f32[1,128], index: 2, kind: input, shape index: {}]   ;;  %s3463_s3 = inlined_call_operand.vmem [shape: bf16[400,128], index: 3, kind: output, shape index: {}]  }
   0x1   :  { %v2077_v0 = vld [vmem:[%s3460_s1 + $0x20] sm:$0xf]  ;;  %v2633_v1 = vld [vmem:[%s3460_s1 + $0x20] sm:$0x30]  ;;  %v307_v3 = vsel %vm305_vm0, 4294967295, %v2886_v2  ;;  %v2632_v7 = vld [vmem:[%s3460_s1 + $0x18] sm:$0xff] }
   0x2   :  { %v2078_v4 = vor.u32 %v2633_v1, %v2077_v0  ;;  %v308_v5 = vsel %vm306_vm1, %v307_v3, 0  ;;  %v2631_v8 = vld [vmem:[%s3460_s1 + $0x10] sm:$0xff]  ;;  %v2630_v9 = vld [vmem:[%s3460_s1 + $0x8] sm:$0xff]  ;;  %v2629_v10 = vld [vmem:[%s3460_s1] sm:$0xff] }
   0x3   :  { %v2634_v11 = vld [vmem:[%s3461_s0] sm:$0xff]  ;;  %v2659_v12 = vld [vmem:[%s3461_s0 + $0xc8] sm:$0xff]  ;;  %v2684_v13 = vld [vmem:[%s3461_s0 + $0x190] sm:$0xff] }
   0x4   :  { %v310_v6 = vand.u32 %v2078_v4, %v308_v5  ;;  %v2709_v14 = vld [vmem:[%s3461_s0 + $0x258] sm:$0xff]  ;;  %v2635_v15 = vld [vmem:[%s3461_s0 + $0x8] sm:$0xff]  ;;  %v2660_v16 = vld [vmem:[%s3461_s0 + $0xd0] sm:$0xff] }
   0x5   :  { %v2685_v17 = vld [vmem:[%s3461_s0 + $0x198] sm:$0xff]  ;;  %v2710_v18 = vld [vmem:[%s3461_s0 + $0x260] sm:$0xff]  ;;  %v2636_v19 = vld [vmem:[%s3461_s0 + $0x10] sm:$0xff] }
   0x6   :  { %315 = vmatpush.bf16.msra.mxu0 %v310_v6  ;;  %700 = vmatpush.bf16.msra.mxu1 %v310_v6  ;;  %v2661_v20 = vld [vmem:[%s3461_s0 + $0xd8] sm:$0xff]  ;;  %v2686_v21 = vld [vmem:[%s3461_s0 + $0x1a0] sm:$0xff]  ;;  %v2711_v22 = vld [vmem:[%s3461_s0 + $0x268] sm:$0xff] }
   0x7   :  { %1135 = vmatpush.bf16.msra.mxu2 %v310_v6  ;;  %1570 = vmatpush.bf16.msra.mxu3 %v310_v6  ;;  %v2637_v23 = vld [vmem:[%s3461_s0 + $0x18] sm:$0xff]  ;;  %v2662_v24 = vld [vmem:[%s3461_s0 + $0xe0] sm:$0xff]  ;;  %v2687_v25 = vld [vmem:[%s3461_s0 + $0x1a8] sm:$0xff] }
   0x8   :  { %v2712_v26 = vld [vmem:[%s3461_s0 + $0x270] sm:$0xff]  ;;  %v2638_v27 = vld [vmem:[%s3461_s0 + $0x20] sm:$0xff]  ;;  %v2663_v28 = vld [vmem:[%s3461_s0 + $0xe8] sm:$0xff] }
   0x9   :  { %v2688_v29 = vld [vmem:[%s3461_s0 + $0x1b0] sm:$0xff]  ;;  %v2713_v30 = vld [vmem:[%s3461_s0 + $0x278] sm:$0xff]  ;;  %v2639_v31 = vld [vmem:[%s3461_s0 + $0x28] sm:$0xff] }
   0xa   :  { %316 = vmatpush.bf16.msra.mxu0 %v2632_v7  ;;  %701 = vmatpush.bf16.msra.mxu1 %v2632_v7  ;;  %v2664_v32 = vld [vmem:[%s3461_s0 + $0xf0] sm:$0xff]  ;;  %v2689_v33 = vld [vmem:[%s3461_s0 + $0x1b8] sm:$0xff]  ;;  %v2714_v34 = vld [vmem:[%s3461_s0 + $0x280] sm:$0xff] }
   0xb   :  { %1136 = vmatpush.bf16.msra.mxu2 %v2632_v7  ;;  %1571 = vmatpush.bf16.msra.mxu3 %v2632_v7  ;;  %v2640_v35 = vld [vmem:[%s3461_s0 + $0x30] sm:$0xff]  ;;  %v2665_v36 = vld [vmem:[%s3461_s0 + $0xf8] sm:$0xff]  ;;  %v2690_v37 = vld [vmem:[%s3461_s0 + $0x1c0] sm:$0xff] }
   0xc   :  { %v2715_v38 = vld [vmem:[%s3461_s0 + $0x288] sm:$0xff]  ;;  %v2641_v39 = vld [vmem:[%s3461_s0 + $0x38] sm:$0xff]  ;;  %v2666_v40 = vld [vmem:[%s3461_s0 + $0x100] sm:$0xff] }
   0xd   :  { %v2691_v41 = vld [vmem:[%s3461_s0 + $0x1c8] sm:$0xff]  ;;  %v2716_v42 = vld [vmem:[%s3461_s0 + $0x290] sm:$0xff]  ;;  %v2642_v43 = vld [vmem:[%s3461_s0 + $0x40] sm:$0xff] }
   0xe   :  { %317 = vmatpush.bf16.msra.mxu0 %v2631_v8  ;;  %702 = vmatpush.bf16.msra.mxu1 %v2631_v8  ;;  %v2667_v44 = vld [vmem:[%s3461_s0 + $0x108] sm:$0xff]  ;;  %v2692_v47 = vld [vmem:[%s3461_s0 + $0x1d0] sm:$0xff]  ;;  %v2717_v48 = vld [vmem:[%s3461_s0 + $0x298] sm:$0xff] }
   0xf   :  { %1137 = vmatpush.bf16.msra.mxu2 %v2631_v8  ;;  %1572 = vmatpush.bf16.msra.mxu3 %v2631_v8  ;;  %v3072_v56 = vld [vmem:[%s3462_s2] ss:$0 sm:$0xff]  ;;  %v2643_v60 = vld [vmem:[%s3461_s0 + $0x48] sm:$0xff]  ;;  %v2668_v61 = vld [vmem:[%s3461_s0 + $0x110] sm:$0xff] }
  0x10   :  { %v2693_v1 = vld [vmem:[%s3461_s0 + $0x1d8] sm:$0xff]  ;;  %v2718_v2 = vld [vmem:[%s3461_s0 + $0x2a0] sm:$0xff] }
  0x12   :  { %318 = vmatpush.bf16.msra.mxu0 %v2630_v9  ;;  %703 = vmatpush.bf16.msra.mxu1 %v2630_v9 }
  0x13   :  { %1138 = vmatpush.bf16.msra.mxu2 %v2630_v9  ;;  %1573 = vmatpush.bf16.msra.mxu3 %v2630_v9 }
  0x16   :  { %319 = vmatpush.bf16.msra.mxu0 %v2629_v10  ;;  %704 = vmatpush.bf16.msra.mxu1 %v2629_v10 }
  0x17   :  { %1139 = vmatpush.bf16.msra.mxu2 %v2629_v10  ;;  %1574 = vmatpush.bf16.msra.mxu3 %v2629_v10 }
  0x19   :  { %2079 = vmatmul.msk.bf16.vlgmr.msra.gmra.mxu0 %vm229_vm2, %v2634_v11  ;;  %2254 = vmatmul.msk.bf16.vlgmr.msra.gmra.mxu1 %vm229_vm2, %v2659_v12 }
  0x1a   :  { %2429 = vmatmul.msk.bf16.vlgmr.msra.gmra.mxu2 %vm229_vm2, %v2684_v13  ;;  %2604 = vmatmul.msk.bf16.vlgmr.msra.gmra.mxu3 %vm229_vm2, %v2709_v14 }
  0x29   :  { %2080 = vmatmul.msk.bf16.gmra.mxu0 %vm229_vm2, %v2635_v15  ;;  %2255 = vmatmul.msk.bf16.gmra.mxu1 %vm229_vm2, %v2660_v16 }
  0x2a   :  { %2430 = vmatmul.msk.bf16.gmra.mxu2 %vm229_vm2, %v2685_v17  ;;  %2605 = vmatmul.msk.bf16.gmra.mxu3 %vm229_vm2, %v2710_v18 }
  0x39   :  { %2081 = vmatmul.msk.bf16.gmra.mxu0 %vm229_vm2, %v2636_v19  ;;  %2256 = vmatmul.msk.bf16.gmra.mxu1 %vm229_vm2, %v2661_v20  ;;  %v2644_v19 = vld [vmem:[%s3461_s0 + $0x50] sm:$0xff]  ;;  %v2669_v20 = vld [vmem:[%s3461_s0 + $0x118] sm:$0xff] }
  0x3a   :  { %2431 = vmatmul.msk.bf16.gmra.mxu2 %vm229_vm2, %v2686_v21  ;;  %2606 = vmatmul.msk.bf16.gmra.mxu3 %vm229_vm2, %v2711_v22 }
  0x49   :  { %2082 = vmatmul.msk.bf16.gmra.mxu0 %vm229_vm2, %v2637_v23  ;;  %2257 = vmatmul.msk.bf16.gmra.mxu1 %vm229_vm2, %v2662_v24  ;;  %v2694_v24 = vld [vmem:[%s3461_s0 + $0x1e0] sm:$0xff] }
  0x4a   :  { %2432 = vmatmul.msk.bf16.gmra.mxu2 %vm229_vm2, %v2687_v25  ;;  %2607 = vmatmul.msk.bf16.gmra.mxu3 %vm229_vm2, %v2712_v26  ;;  %v2719_v25 = vld [vmem:[%s3461_s0 + $0x2a8] sm:$0xff] }
  0x59   :  { %2083 = vmatmul.msk.bf16.gmra.mxu0 %vm229_vm2, %v2638_v27  ;;  %2258 = vmatmul.msk.bf16.gmra.mxu1 %vm229_vm2, %v2663_v28 }
  0x5a   :  { %2433 = vmatmul.msk.bf16.gmra.mxu2 %vm229_vm2, %v2688_v29  ;;  %2608 = vmatmul.msk.bf16.gmra.mxu3 %vm229_vm2, %v2713_v30 }
  0x69   :  { %2084 = vmatmul.msk.bf16.gmra.mxu0 %vm229_vm2, %v2639_v31  ;;  %2259 = vmatmul.msk.bf16.gmra.mxu1 %vm229_vm2, %v2664_v32 }
  0x6a   :  { %2434 = vmatmul.msk.bf16.gmra.mxu2 %vm229_vm2, %v2689_v33  ;;  %2609 = vmatmul.msk.bf16.gmra.mxu3 %vm229_vm2, %v2714_v34 }
  0x79   :  { %2085 = vmatmul.msk.bf16.gmra.mxu0 %vm229_vm2, %v2640_v35  ;;  %2260 = vmatmul.msk.bf16.gmra.mxu1 %vm229_vm2, %v2665_v36 }
  0x7a   :  { %2435 = vmatmul.msk.bf16.gmra.mxu2 %vm229_vm2, %v2690_v37  ;;  %2610 = vmatmul.msk.bf16.gmra.mxu3 %vm229_vm2, %v2715_v38 }
  0x89   :  { %2086 = vmatmul.msk.bf16.gmra.mxu0 %vm229_vm2, %v2641_v39  ;;  %2261 = vmatmul.msk.bf16.gmra.mxu1 %vm229_vm2, %v2666_v40 }
  0x8a   :  { %2436 = vmatmul.msk.bf16.gmra.mxu2 %vm229_vm2, %v2691_v41  ;;  %2611 = vmatmul.msk.bf16.gmra.mxu3 %vm229_vm2, %v2716_v42  ;;  %v2645_v42 = vld [vmem:[%s3461_s0 + $0x58] sm:$0xff] }
  0x96   :  { %v321_v45 = vpop.f32.mrf.mxu0  ;;  %v706_v46 = vpop.f32.mrf.mxu1 }
  0x97   :  { %v831_v49 = vmax.f32 %v321_v45, %v706_v46 }
  0x99   :  { %2087 = vmatmul.msk.bf16.gmra.mxu0 %vm229_vm2, %v2642_v43  ;;  %2262 = vmatmul.msk.bf16.gmra.mxu1 %vm229_vm2, %v2667_v44  ;;  %v2670_v43 = vld [vmem:[%s3461_s0 + $0x120] sm:$0xff] }
  0x9a   :  { %2437 = vmatmul.msk.bf16.gmra.mxu2 %vm229_vm2, %v2692_v47  ;;  %2612 = vmatmul.msk.bf16.gmra.mxu3 %vm229_vm2, %v2717_v48  ;;  %v2695_v47 = vld [vmem:[%s3461_s0 + $0x1e8] sm:$0xff]  ;;  %v2720_v48 = vld [vmem:[%s3461_s0 + $0x2b0] sm:$0xff] }
  0x9d   :  { %v1141_v50 = vpop.f32.mrf.mxu2  ;;  %v1576_v51 = vpop.f32.mrf.mxu3 }
  0x9e   :  { %v323_v52 = vpop.f32.mrf.mxu0  ;;  %v708_v53 = vpop.f32.mrf.mxu1  ;;  %v1266_v54 = vmax.f32 %v831_v49, %v1141_v50 }
  0x9f   :  { %v832_v57 = vmax.f32 %v323_v52, %v708_v53 }
  0xa0   :  { %v1701_v55 = vmax.f32 %v1266_v54, %v1576_v51 }
  0xa2   :  { %v1755_v3 = vadd.f32 %v3072_v56, %v1701_v55 }
  0xa4   :  { %v1805_v6 = vmax.f32 %v1755_v3, 0.0  ;;  %v2671_v3 = vld [vmem:[%s3461_s0 + $0x128] sm:$0xff] }
  0xa5   :  { %v1143_v58 = vpop.f32.mrf.mxu2  ;;  %v1578_v59 = vpop.f32.mrf.mxu3 }
  0xa6   :  { %v1267_v62 = vmax.f32 %v832_v57, %v1143_v58  ;;  %v326_v63 = vpop.f32.mrf.mxu0  ;;  %v711_v0 = vpop.f32.mrf.mxu1 }
  0xa7   :  { %v833_v8 = vmax.f32 %v326_v63, %v711_v0 }
  0xa8   :  { %v1702_v4 = vmax.f32 %v1267_v62, %v1578_v59 }
  0xa9   :  { %2088 = vmatmul.msk.bf16.gmra.mxu0 %vm229_vm2, %v2643_v60  ;;  %2263 = vmatmul.msk.bf16.gmra.mxu1 %vm229_vm2, %v2668_v61 }
  0xaa   :  { %v1756_v5 = vadd.f32 %v3072_v56, %v1702_v4  ;;  %2438 = vmatmul.msk.bf16.gmra.mxu2 %vm229_vm2, %v2693_v1  ;;  %2613 = vmatmul.msk.bf16.gmra.mxu3 %vm229_vm2, %v2718_v2  ;;  %v2646_v2 = vld [vmem:[%s3461_s0 + $0x60] sm:$0xff] }
  0xac   :  { %v1806_v7 = vmax.f32 %v1756_v5, 0.0 }
  0xad   :  { %v1146_v9 = vpop.f32.mrf.mxu2  ;;  %v1581_v10 = vpop.f32.mrf.mxu3 }
  0xae   :  { %v2737_v11 = vpack.c.bf16 %v1806_v7, %v1805_v6  ;;  %v328_v12 = vpop.f32.mrf.mxu0  ;;  %v713_v13 = vpop.f32.mrf.mxu1  ;;  %v1268_v14 = vmax.f32 %v833_v8, %v1146_v9  ;;  %v2696_v7 = vld [vmem:[%s3461_s0 + $0x1f0] sm:$0xff]  ;;  %v2721_v8 = vld [vmem:[%s3461_s0 + $0x2b8] sm:$0xff] }
  0xaf   :  { %v834_v16 = vmax.f32 %v328_v12, %v713_v13 }
  0xb0   :  { %2738 = vst [vmem:[%s3463_s3] sm:$0xff] %v2737_v11   ;;  %v1703_v15 = vmax.f32 %v1268_v14, %v1581_v10 }
  0xb2   :  { %v1757_v26 = vadd.f32 %v3072_v56, %v1703_v15 }
  0xb4   :  { %v1807_v29 = vmax.f32 %v1757_v26, 0.0  ;;  %v2672_v26 = vld [vmem:[%s3461_s0 + $0x130] sm:$0xff] }
  0xb5   :  { %v1148_v17 = vpop.f32.mrf.mxu2  ;;  %v1583_v18 = vpop.f32.mrf.mxu3 }
  0xb6   :  { %v1269_v21 = vmax.f32 %v834_v16, %v1148_v17  ;;  %v331_v22 = vpop.f32.mrf.mxu0  ;;  %v716_v23 = vpop.f32.mrf.mxu1 }
  0xb7   :  { %v835_v31 = vmax.f32 %v331_v22, %v716_v23 }
  0xb8   :  { %v1704_v27 = vmax.f32 %v1269_v21, %v1583_v18 }
  0xb9   :  { %2089 = vmatmul.msk.bf16.gmra.mxu0 %vm229_vm2, %v2644_v19  ;;  %2264 = vmatmul.msk.bf16.gmra.mxu1 %vm229_vm2, %v2669_v20 }
  0xba   :  { %v1758_v28 = vadd.f32 %v3072_v56, %v1704_v27  ;;  %2439 = vmatmul.msk.bf16.gmra.mxu2 %vm229_vm2, %v2694_v24  ;;  %2614 = vmatmul.msk.bf16.gmra.mxu3 %vm229_vm2, %v2719_v25  ;;  %v2647_v25 = vld [vmem:[%s3461_s0 + $0x68] sm:$0xff] }
  0xbc   :  { %v1808_v30 = vmax.f32 %v1758_v28, 0.0 }
  0xbd   :  { %v1151_v32 = vpop.f32.mrf.mxu2  ;;  %v1586_v33 = vpop.f32.mrf.mxu3 }
  0xbe   :  { %v2742_v34 = vpack.c.bf16 %v1808_v30, %v1807_v29  ;;  %v333_v35 = vpop.f32.mrf.mxu0  ;;  %v718_v36 = vpop.f32.mrf.mxu1  ;;  %v1270_v37 = vmax.f32 %v835_v31, %v1151_v32  ;;  %v2697_v30 = vld [vmem:[%s3461_s0 + $0x1f8] sm:$0xff]  ;;  %v2722_v31 = vld [vmem:[%s3461_s0 + $0x2c0] sm:$0xff] }
  0xbf   :  { %v836_v39 = vmax.f32 %v333_v35, %v718_v36 }
  0xc0   :  { %2859 = vst [vmem:[%s3463_s3 + $0x8] sm:$0xff] %v2742_v34   ;;  %v1705_v38 = vmax.f32 %v1270_v37, %v1586_v33 }
  0xc2   :  { %v1759_v49 = vadd.f32 %v3072_v56, %v1705_v38 }
  0xc4   :  { %v1809_v52 = vmax.f32 %v1759_v49, 0.0  ;;  %v2673_v49 = vld [vmem:[%s3461_s0 + $0x138] sm:$0xff] }
  0xc5   :  { %v1153_v40 = vpop.f32.mrf.mxu2  ;;  %v1588_v41 = vpop.f32.mrf.mxu3 }
  0xc6   :  { %v1271_v44 = vmax.f32 %v836_v39, %v1153_v40  ;;  %v336_v45 = vpop.f32.mrf.mxu0  ;;  %v721_v46 = vpop.f32.mrf.mxu1 }
  0xc7   :  { %v837_v54 = vmax.f32 %v336_v45, %v721_v46 }
  0xc8   :  { %v1706_v50 = vmax.f32 %v1271_v44, %v1588_v41 }
  0xc9   :  { %2090 = vmatmul.msk.bf16.gmra.mxu0 %vm229_vm2, %v2645_v42  ;;  %2265 = vmatmul.msk.bf16.gmra.mxu1 %vm229_vm2, %v2670_v43 }
  0xca   :  { %v1760_v51 = vadd.f32 %v3072_v56, %v1706_v50  ;;  %2440 = vmatmul.msk.bf16.gmra.mxu2 %vm229_vm2, %v2695_v47  ;;  %2615 = vmatmul.msk.bf16.gmra.mxu3 %vm229_vm2, %v2720_v48  ;;  %v2648_v48 = vld [vmem:[%s3461_s0 + $0x70] sm:$0xff] }
  0xcc   :  { %v1810_v53 = vmax.f32 %v1760_v51, 0.0 }
  0xcd   :  { %v1156_v55 = vpop.f32.mrf.mxu2  ;;  %v1591_v57 = vpop.f32.mrf.mxu3 }
  0xce   :  { %v2747_v58 = vpack.c.bf16 %v1810_v53, %v1809_v52  ;;  %v338_v59 = vpop.f32.mrf.mxu0  ;;  %v723_v60 = vpop.f32.mrf.mxu1  ;;  %v1272_v61 = vmax.f32 %v837_v54, %v1156_v55  ;;  %v2698_v53 = vld [vmem:[%s3461_s0 + $0x200] sm:$0xff]  ;;  %v2723_v54 = vld [vmem:[%s3461_s0 + $0x2c8] sm:$0xff] }
  0xcf   :  { %v838_v63 = vmax.f32 %v338_v59, %v723_v60 }
  0xd0   :  { %2860 = vst [vmem:[%s3463_s3 + $0x10] sm:$0xff] %v2747_v58   ;;  %v1707_v62 = vmax.f32 %v1272_v61, %v1591_v57 }
  0xd2   :  { %v1761_v9 = vadd.f32 %v3072_v56, %v1707_v62 }
  0xd4   :  { %v1811_v12 = vmax.f32 %v1761_v9, 0.0  ;;  %v2674_v9 = vld [vmem:[%s3461_s0 + $0x140] sm:$0xff] }
  0xd5   :  { %v1158_v0 = vpop.f32.mrf.mxu2  ;;  %v1593_v1 = vpop.f32.mrf.mxu3 }
  0xd6   :  { %v1273_v4 = vmax.f32 %v838_v63, %v1158_v0  ;;  %v341_v5 = vpop.f32.mrf.mxu0  ;;  %v726_v6 = vpop.f32.mrf.mxu1 }
  0xd7   :  { %v839_v14 = vmax.f32 %v341_v5, %v726_v6 }
  0xd8   :  { %v1708_v10 = vmax.f32 %v1273_v4, %v1593_v1 }
  0xd9   :  { %2091 = vmatmul.msk.bf16.gmra.mxu0 %vm229_vm2, %v2646_v2  ;;  %2266 = vmatmul.msk.bf16.gmra.mxu1 %vm229_vm2, %v2671_v3 }
  0xda   :  { %v1762_v11 = vadd.f32 %v3072_v56, %v1708_v10  ;;  %2441 = vmatmul.msk.bf16.gmra.mxu2 %vm229_vm2, %v2696_v7  ;;  %2616 = vmatmul.msk.bf16.gmra.mxu3 %vm229_vm2, %v2721_v8  ;;  %v2649_v8 = vld [vmem:[%s3461_s0 + $0x78] sm:$0xff] }
  0xdc   :  { %v1812_v13 = vmax.f32 %v1762_v11, 0.0 }
  0xdd   :  { %v1161_v15 = vpop.f32.mrf.mxu2  ;;  %v1596_v16 = vpop.f32.mrf.mxu3 }
  0xde   :  { %v2752_v17 = vpack.c.bf16 %v1812_v13, %v1811_v12  ;;  %v343_v18 = vpop.f32.mrf.mxu0  ;;  %v728_v19 = vpop.f32.mrf.mxu1  ;;  %v1274_v20 = vmax.f32 %v839_v14, %v1161_v15  ;;  %v2699_v13 = vld [vmem:[%s3461_s0 + $0x208] sm:$0xff]  ;;  %v2724_v14 = vld [vmem:[%s3461_s0 + $0x2d0] sm:$0xff] }
  0xdf   :  { %v840_v22 = vmax.f32 %v343_v18, %v728_v19 }
  0xe0   :  { %2861 = vst [vmem:[%s3463_s3 + $0x18] sm:$0xff] %v2752_v17   ;;  %v1709_v21 = vmax.f32 %v1274_v20, %v1596_v16 }
  0xe2   :  { %v1763_v32 = vadd.f32 %v3072_v56, %v1709_v21 }
  0xe4   :  { %v1813_v35 = vmax.f32 %v1763_v32, 0.0  ;;  %v2675_v32 = vld [vmem:[%s3461_s0 + $0x148] sm:$0xff] }
  0xe5   :  { %v1163_v23 = vpop.f32.mrf.mxu2  ;;  %v1598_v24 = vpop.f32.mrf.mxu3 }
  0xe6   :  { %v1275_v27 = vmax.f32 %v840_v22, %v1163_v23  ;;  %v346_v28 = vpop.f32.mrf.mxu0  ;;  %v731_v29 = vpop.f32.mrf.mxu1 }
  0xe7   :  { %v841_v37 = vmax.f32 %v346_v28, %v731_v29 }
  0xe8   :  { %v1710_v33 = vmax.f32 %v1275_v27, %v1598_v24 }
  0xe9   :  { %2092 = vmatmul.msk.bf16.gmra.mxu0 %vm229_vm2, %v2647_v25  ;;  %2267 = vmatmul.msk.bf16.gmra.mxu1 %vm229_vm2, %v2672_v26 }
  0xea   :  { %v1764_v34 = vadd.f32 %v3072_v56, %v1710_v33  ;;  %2442 = vmatmul.msk.bf16.gmra.mxu2 %vm229_vm2, %v2697_v30  ;;  %2617 = vmatmul.msk.bf16.gmra.mxu3 %vm229_vm2, %v2722_v31  ;;  %v2650_v31 = vld [vmem:[%s3461_s0 + $0x80] sm:$0xff] }
  0xec   :  { %v1814_v36 = vmax.f32 %v1764_v34, 0.0 }
  0xed   :  { %v1166_v38 = vpop.f32.mrf.mxu2  ;;  %v1601_v39 = vpop.f32.mrf.mxu3 }
  0xee   :  { %v2757_v40 = vpack.c.bf16 %v1814_v36, %v1813_v35  ;;  %v348_v41 = vpop.f32.mrf.mxu0  ;;  %v733_v42 = vpop.f32.mrf.mxu1  ;;  %v1276_v43 = vmax.f32 %v841_v37, %v1166_v38  ;;  %v2700_v36 = vld [vmem:[%s3461_s0 + $0x210] sm:$0xff]  ;;  %v2725_v37 = vld [vmem:[%s3461_s0 + $0x2d8] sm:$0xff] }
  0xef   :  { %v842_v45 = vmax.f32 %v348_v41, %v733_v42 }
  0xf0   :  { %2862 = vst [vmem:[%s3463_s3 + $0x20] sm:$0xff] %v2757_v40   ;;  %v1711_v44 = vmax.f32 %v1276_v43, %v1601_v39 }
  0xf2   :  { %v1765_v55 = vadd.f32 %v3072_v56, %v1711_v44 }
  0xf4   :  { %v1815_v59 = vmax.f32 %v1765_v55, 0.0  ;;  %v2676_v55 = vld [vmem:[%s3461_s0 + $0x150] sm:$0xff] }
  0xf5   :  { %v1168_v46 = vpop.f32.mrf.mxu2  ;;  %v1603_v47 = vpop.f32.mrf.mxu3 }
  0xf6   :  { %v1277_v50 = vmax.f32 %v842_v45, %v1168_v46  ;;  %v351_v51 = vpop.f32.mrf.mxu0  ;;  %v736_v52 = vpop.f32.mrf.mxu1 }
  0xf7   :  { %v843_v61 = vmax.f32 %v351_v51, %v736_v52 }
  0xf8   :  { %v1712_v57 = vmax.f32 %v1277_v50, %v1603_v47 }
  0xf9   :  { %2093 = vmatmul.msk.bf16.gmra.mxu0 %vm229_vm2, %v2648_v48  ;;  %2268 = vmatmul.msk.bf16.gmra.mxu1 %vm229_vm2, %v2673_v49 }
  0xfa   :  { %v1766_v58 = vadd.f32 %v3072_v56, %v1712_v57  ;;  %2443 = vmatmul.msk.bf16.gmra.mxu2 %vm229_vm2, %v2698_v53  ;;  %2618 = vmatmul.msk.bf16.gmra.mxu3 %vm229_vm2, %v2723_v54  ;;  %v2651_v54 = vld [vmem:[%s3461_s0 + $0x88] sm:$0xff] }
  0xfc   :  { %v1816_v60 = vmax.f32 %v1766_v58, 0.0 }
  0xfd   :  { %v1171_v62 = vpop.f32.mrf.mxu2  ;;  %v1606_v63 = vpop.f32.mrf.mxu3 }
  0xfe   :  { %v2762_v0 = vpack.c.bf16 %v1816_v60, %v1815_v59  ;;  %v353_v1 = vpop.f32.mrf.mxu0  ;;  %v738_v2 = vpop.f32.mrf.mxu1  ;;  %v1278_v3 = vmax.f32 %v843_v61, %v1171_v62  ;;  %v2701_v60 = vld [vmem:[%s3461_s0 + $0x218] sm:$0xff]  ;;  %v2726_v61 = vld [vmem:[%s3461_s0 + $0x2e0] sm:$0xff] }
  0xff   :  { %v844_v5 = vmax.f32 %v353_v1, %v738_v2 }
 0x100   :  { %2863 = vst [vmem:[%s3463_s3 + $0x28] sm:$0xff] %v2762_v0   ;;  %v1713_v4 = vmax.f32 %v1278_v3, %v1606_v63 }
 0x102   :  { %v1767_v15 = vadd.f32 %v3072_v56, %v1713_v4 }
 0x104   :  { %v1817_v18 = vmax.f32 %v1767_v15, 0.0  ;;  %v2677_v15 = vld [vmem:[%s3461_s0 + $0x158] sm:$0xff] }
 0x105   :  { %v1173_v6 = vpop.f32.mrf.mxu2  ;;  %v1608_v7 = vpop.f32.mrf.mxu3 }
 0x106   :  { %v1279_v10 = vmax.f32 %v844_v5, %v1173_v6  ;;  %v356_v11 = vpop.f32.mrf.mxu0  ;;  %v741_v12 = vpop.f32.mrf.mxu1 }
 0x107   :  { %v845_v20 = vmax.f32 %v356_v11, %v741_v12 }
 0x108   :  { %v1714_v16 = vmax.f32 %v1279_v10, %v1608_v7 }
 0x109   :  { %2094 = vmatmul.msk.bf16.gmra.mxu0 %vm229_vm2, %v2649_v8  ;;  %2269 = vmatmul.msk.bf16.gmra.mxu1 %vm229_vm2, %v2674_v9 }
 0x10a   :  { %v1768_v17 = vadd.f32 %v3072_v56, %v1714_v16  ;;  %2444 = vmatmul.msk.bf16.gmra.mxu2 %vm229_vm2, %v2699_v13  ;;  %2619 = vmatmul.msk.bf16.gmra.mxu3 %vm229_vm2, %v2724_v14  ;;  %v2652_v14 = vld [vmem:[%s3461_s0 + $0x90] sm:$0xff] }
 0x10c   :  { %v1818_v19 = vmax.f32 %v1768_v17, 0.0 }
 0x10d   :  { %v1176_v21 = vpop.f32.mrf.mxu2  ;;  %v1611_v22 = vpop.f32.mrf.mxu3 }
 0x10e   :  { %v2767_v23 = vpack.c.bf16 %v1818_v19, %v1817_v18  ;;  %v358_v24 = vpop.f32.mrf.mxu0  ;;  %v743_v25 = vpop.f32.mrf.mxu1  ;;  %v1280_v26 = vmax.f32 %v845_v20, %v1176_v21  ;;  %v2702_v19 = vld [vmem:[%s3461_s0 + $0x220] sm:$0xff]  ;;  %v2727_v20 = vld [vmem:[%s3461_s0 + $0x2e8] sm:$0xff] }
 0x10f   :  { %v846_v28 = vmax.f32 %v358_v24, %v743_v25 }
 0x110   :  { %2864 = vst [vmem:[%s3463_s3 + $0x30] sm:$0xff] %v2767_v23   ;;  %v1715_v27 = vmax.f32 %v1280_v26, %v1611_v22 }
 0x112   :  { %v1769_v38 = vadd.f32 %v3072_v56, %v1715_v27 }
 0x114   :  { %v1819_v41 = vmax.f32 %v1769_v38, 0.0  ;;  %v2678_v38 = vld [vmem:[%s3461_s0 + $0x160] sm:$0xff] }
 0x115   :  { %v1178_v29 = vpop.f32.mrf.mxu2  ;;  %v1613_v30 = vpop.f32.mrf.mxu3 }
 0x116   :  { %v1281_v33 = vmax.f32 %v846_v28, %v1178_v29  ;;  %v361_v34 = vpop.f32.mrf.mxu0  ;;  %v746_v35 = vpop.f32.mrf.mxu1 }
 0x117   :  { %v847_v43 = vmax.f32 %v361_v34, %v746_v35 }
 0x118   :  { %v1716_v39 = vmax.f32 %v1281_v33, %v1613_v30 }
 0x119   :  { %2095 = vmatmul.msk.bf16.gmra.mxu0 %vm229_vm2, %v2650_v31  ;;  %2270 = vmatmul.msk.bf16.gmra.mxu1 %vm229_vm2, %v2675_v32 }
 0x11a   :  { %v1770_v40 = vadd.f32 %v3072_v56, %v1716_v39  ;;  %2445 = vmatmul.msk.bf16.gmra.mxu2 %vm229_vm2, %v2700_v36  ;;  %2620 = vmatmul.msk.bf16.gmra.mxu3 %vm229_vm2, %v2725_v37  ;;  %v2653_v37 = vld [vmem:[%s3461_s0 + $0x98] sm:$0xff] }
 0x11c   :  { %v1820_v42 = vmax.f32 %v1770_v40, 0.0 }
 0x11d   :  { %v1181_v44 = vpop.f32.mrf.mxu2  ;;  %v1616_v45 = vpop.f32.mrf.mxu3 }
 0x11e   :  { %v2772_v46 = vpack.c.bf16 %v1820_v42, %v1819_v41  ;;  %v363_v47 = vpop.f32.mrf.mxu0  ;;  %v748_v48 = vpop.f32.mrf.mxu1  ;;  %v1282_v49 = vmax.f32 %v847_v43, %v1181_v44  ;;  %v2703_v42 = vld [vmem:[%s3461_s0 + $0x228] sm:$0xff]  ;;  %v2728_v43 = vld [vmem:[%s3461_s0 + $0x2f0] sm:$0xff] }
 0x11f   :  { %v848_v51 = vmax.f32 %v363_v47, %v748_v48 }
 0x120   :  { %2865 = vst [vmem:[%s3463_s3 + $0x38] sm:$0xff] %v2772_v46   ;;  %v1717_v50 = vmax.f32 %v1282_v49, %v1616_v45 }
 0x122   :  { %v1771_v62 = vadd.f32 %v3072_v56, %v1717_v50 }
 0x124   :  { %v1821_v1 = vmax.f32 %v1771_v62, 0.0  ;;  %v2679_v62 = vld [vmem:[%s3461_s0 + $0x168] sm:$0xff] }
 0x125   :  { %v1183_v52 = vpop.f32.mrf.mxu2  ;;  %v1618_v53 = vpop.f32.mrf.mxu3 }
 0x126   :  { %v1283_v57 = vmax.f32 %v848_v51, %v1183_v52  ;;  %v366_v58 = vpop.f32.mrf.mxu0  ;;  %v751_v59 = vpop.f32.mrf.mxu1 }
 0x127   :  { %v849_v3 = vmax.f32 %v366_v58, %v751_v59 }
 0x128   :  { %v1718_v63 = vmax.f32 %v1283_v57, %v1618_v53 }
 0x129   :  { %2096 = vmatmul.msk.bf16.gmra.mxu0 %vm229_vm2, %v2651_v54  ;;  %2271 = vmatmul.msk.bf16.gmra.mxu1 %vm229_vm2, %v2676_v55 }
 0x12a   :  { %v1772_v0 = vadd.f32 %v3072_v56, %v1718_v63  ;;  %2446 = vmatmul.msk.bf16.gmra.mxu2 %vm229_vm2, %v2701_v60  ;;  %2621 = vmatmul.msk.bf16.gmra.mxu3 %vm229_vm2, %v2726_v61  ;;  %v2654_v61 = vld [vmem:[%s3461_s0 + $0xa0] sm:$0xff] }
 0x12c   :  { %v1822_v2 = vmax.f32 %v1772_v0, 0.0 }
 0x12d   :  { %v1186_v4 = vpop.f32.mrf.mxu2  ;;  %v1621_v5 = vpop.f32.mrf.mxu3 }
 0x12e   :  { %v2777_v6 = vpack.c.bf16 %v1822_v2, %v1821_v1  ;;  %v368_v7 = vpop.f32.mrf.mxu0  ;;  %v753_v8 = vpop.f32.mrf.mxu1  ;;  %v1284_v9 = vmax.f32 %v849_v3, %v1186_v4  ;;  %v2704_v2 = vld [vmem:[%s3461_s0 + $0x230] sm:$0xff]  ;;  %v2729_v3 = vld [vmem:[%s3461_s0 + $0x2f8] sm:$0xff] }
 0x12f   :  { %v850_v11 = vmax.f32 %v368_v7, %v753_v8 }
 0x130   :  { %2866 = vst [vmem:[%s3463_s3 + $0x40] sm:$0xff] %v2777_v6   ;;  %v1719_v10 = vmax.f32 %v1284_v9, %v1621_v5 }
 0x132   :  { %v1773_v21 = vadd.f32 %v3072_v56, %v1719_v10 }
 0x134   :  { %v1823_v24 = vmax.f32 %v1773_v21, 0.0  ;;  %v2680_v21 = vld [vmem:[%s3461_s0 + $0x170] sm:$0xff] }
 0x135   :  { %v1188_v12 = vpop.f32.mrf.mxu2  ;;  %v1623_v13 = vpop.f32.mrf.mxu3 }
 0x136   :  { %v1285_v16 = vmax.f32 %v850_v11, %v1188_v12  ;;  %v371_v17 = vpop.f32.mrf.mxu0  ;;  %v756_v18 = vpop.f32.mrf.mxu1 }
 0x137   :  { %v851_v26 = vmax.f32 %v371_v17, %v756_v18 }
 0x138   :  { %v1720_v22 = vmax.f32 %v1285_v16, %v1623_v13 }
 0x139   :  { %2097 = vmatmul.msk.bf16.gmra.mxu0 %vm229_vm2, %v2652_v14  ;;  %2272 = vmatmul.msk.bf16.gmra.mxu1 %vm229_vm2, %v2677_v15 }
 0x13a   :  { %v1774_v23 = vadd.f32 %v3072_v56, %v1720_v22  ;;  %2447 = vmatmul.msk.bf16.gmra.mxu2 %vm229_vm2, %v2702_v19  ;;  %2622 = vmatmul.msk.bf16.gmra.mxu3 %vm229_vm2, %v2727_v20  ;;  %v2655_v20 = vld [vmem:[%s3461_s0 + $0xa8] sm:$0xff] }
 0x13c   :  { %v1824_v25 = vmax.f32 %v1774_v23, 0.0 }
 0x13d   :  { %v1191_v27 = vpop.f32.mrf.mxu2  ;;  %v1626_v28 = vpop.f32.mrf.mxu3 }
 0x13e   :  { %v2782_v29 = vpack.c.bf16 %v1824_v25, %v1823_v24  ;;  %v373_v30 = vpop.f32.mrf.mxu0  ;;  %v758_v31 = vpop.f32.mrf.mxu1  ;;  %v1286_v32 = vmax.f32 %v851_v26, %v1191_v27  ;;  %v2705_v25 = vld [vmem:[%s3461_s0 + $0x238] sm:$0xff]  ;;  %v2730_v26 = vld [vmem:[%s3461_s0 + $0x300] sm:$0xff] }
 0x13f   :  { %v852_v34 = vmax.f32 %v373_v30, %v758_v31 }
 0x140   :  { %2867 = vst [vmem:[%s3463_s3 + $0x48] sm:$0xff] %v2782_v29   ;;  %v1721_v33 = vmax.f32 %v1286_v32, %v1626_v28 }
 0x142   :  { %v1775_v44 = vadd.f32 %v3072_v56, %v1721_v33 }
 0x144   :  { %v1825_v47 = vmax.f32 %v1775_v44, 0.0  ;;  %v2681_v44 = vld [vmem:[%s3461_s0 + $0x178] sm:$0xff] }
 0x145   :  { %v1193_v35 = vpop.f32.mrf.mxu2  ;;  %v1628_v36 = vpop.f32.mrf.mxu3 }
 0x146   :  { %v1287_v39 = vmax.f32 %v852_v34, %v1193_v35  ;;  %v376_v40 = vpop.f32.mrf.mxu0  ;;  %v761_v41 = vpop.f32.mrf.mxu1 }
 0x147   :  { %v853_v49 = vmax.f32 %v376_v40, %v761_v41 }
 0x148   :  { %v1722_v45 = vmax.f32 %v1287_v39, %v1628_v36 }
 0x149   :  { %2098 = vmatmul.msk.bf16.gmra.mxu0 %vm229_vm2, %v2653_v37  ;;  %2273 = vmatmul.msk.bf16.gmra.mxu1 %vm229_vm2, %v2678_v38 }
 0x14a   :  { %v1776_v46 = vadd.f32 %v3072_v56, %v1722_v45  ;;  %2448 = vmatmul.msk.bf16.gmra.mxu2 %vm229_vm2, %v2703_v42  ;;  %2623 = vmatmul.msk.bf16.gmra.mxu3 %vm229_vm2, %v2728_v43  ;;  %v2656_v43 = vld [vmem:[%s3461_s0 + $0xb0] sm:$0xff] }
 0x14c   :  { %v1826_v48 = vmax.f32 %v1776_v46, 0.0 }
 0x14d   :  { %v1196_v50 = vpop.f32.mrf.mxu2  ;;  %v1631_v51 = vpop.f32.mrf.mxu3 }
 0x14e   :  { %v2787_v52 = vpack.c.bf16 %v1826_v48, %v1825_v47  ;;  %v378_v53 = vpop.f32.mrf.mxu0  ;;  %v763_v54 = vpop.f32.mrf.mxu1  ;;  %v1288_v55 = vmax.f32 %v853_v49, %v1196_v50  ;;  %v2706_v48 = vld [vmem:[%s3461_s0 + $0x240] sm:$0xff]  ;;  %v2731_v49 = vld [vmem:[%s3461_s0 + $0x308] sm:$0xff] }
 0x14f   :  { %v854_v58 = vmax.f32 %v378_v53, %v763_v54 }
 0x150   :  { %2868 = vst [vmem:[%s3463_s3 + $0x50] sm:$0xff] %v2787_v52   ;;  %v1723_v57 = vmax.f32 %v1288_v55, %v1631_v51 }
 0x152   :  { %v1777_v4 = vadd.f32 %v3072_v56, %v1723_v57 }
 0x154   :  { %v1827_v7 = vmax.f32 %v1777_v4, 0.0  ;;  %v2682_v4 = vld [vmem:[%s3461_s0 + $0x180] sm:$0xff] }
 0x155   :  { %v1198_v59 = vpop.f32.mrf.mxu2  ;;  %v1633_v60 = vpop.f32.mrf.mxu3 }
 0x156   :  { %v1289_v63 = vmax.f32 %v854_v58, %v1198_v59  ;;  %v381_v0 = vpop.f32.mrf.mxu0  ;;  %v766_v1 = vpop.f32.mrf.mxu1 }
 0x157   :  { %v855_v9 = vmax.f32 %v381_v0, %v766_v1 }
 0x158   :  { %v1724_v5 = vmax.f32 %v1289_v63, %v1633_v60 }
 0x159   :  { %2099 = vmatmul.msk.bf16.gmra.mxu0 %vm229_vm2, %v2654_v61  ;;  %2274 = vmatmul.msk.bf16.gmra.mxu1 %vm229_vm2, %v2679_v62 }
 0x15a   :  { %v1778_v6 = vadd.f32 %v3072_v56, %v1724_v5  ;;  %2449 = vmatmul.msk.bf16.gmra.mxu2 %vm229_vm2, %v2704_v2  ;;  %2624 = vmatmul.msk.bf16.gmra.mxu3 %vm229_vm2, %v2729_v3  ;;  %v2657_v3 = vld [vmem:[%s3461_s0 + $0xb8] sm:$0xff] }
 0x15c   :  { %v1828_v8 = vmax.f32 %v1778_v6, 0.0 }
 0x15d   :  { %v1201_v10 = vpop.f32.mrf.mxu2  ;;  %v1636_v11 = vpop.f32.mrf.mxu3 }
 0x15e   :  { %v2792_v12 = vpack.c.bf16 %v1828_v8, %v1827_v7  ;;  %v383_v13 = vpop.f32.mrf.mxu0  ;;  %v768_v14 = vpop.f32.mrf.mxu1  ;;  %v1290_v15 = vmax.f32 %v855_v9, %v1201_v10  ;;  %v2707_v8 = vld [vmem:[%s3461_s0 + $0x248] sm:$0xff]  ;;  %v2732_v9 = vld [vmem:[%s3461_s0 + $0x310] sm:$0xff] }
 0x15f   :  { %v856_v17 = vmax.f32 %v383_v13, %v768_v14 }
 0x160   :  { %2869 = vst [vmem:[%s3463_s3 + $0x58] sm:$0xff] %v2792_v12   ;;  %v1725_v16 = vmax.f32 %v1290_v15, %v1636_v11 }
 0x162   :  { %v1779_v27 = vadd.f32 %v3072_v56, %v1725_v16 }
 0x164   :  { %v1829_v30 = vmax.f32 %v1779_v27, 0.0  ;;  %v2683_v27 = vld [vmem:[%s3461_s0 + $0x188] sm:$0xff] }
 0x165   :  { %v1203_v18 = vpop.f32.mrf.mxu2  ;;  %v1638_v19 = vpop.f32.mrf.mxu3 }
 0x166   :  { %v1291_v22 = vmax.f32 %v856_v17, %v1203_v18  ;;  %v386_v23 = vpop.f32.mrf.mxu0  ;;  %v771_v24 = vpop.f32.mrf.mxu1 }
 0x167   :  { %v857_v32 = vmax.f32 %v386_v23, %v771_v24 }
 0x168   :  { %v1726_v28 = vmax.f32 %v1291_v22, %v1638_v19 }
 0x169   :  { %2100 = vmatmul.msk.bf16.gmra.mxu0 %vm229_vm2, %v2655_v20  ;;  %2275 = vmatmul.msk.bf16.gmra.mxu1 %vm229_vm2, %v2680_v21 }
 0x16a   :  { %v1780_v29 = vadd.f32 %v3072_v56, %v1726_v28  ;;  %2450 = vmatmul.msk.bf16.gmra.mxu2 %vm229_vm2, %v2705_v25  ;;  %2625 = vmatmul.msk.bf16.gmra.mxu3 %vm229_vm2, %v2730_v26  ;;  %v2658_v26 = vld [vmem:[%s3461_s0 + $0xc0] sm:$0xff] }
 0x16c   :  { %v1830_v31 = vmax.f32 %v1780_v29, 0.0 }
 0x16d   :  { %v1206_v33 = vpop.f32.mrf.mxu2  ;;  %v1641_v34 = vpop.f32.mrf.mxu3 }
 0x16e   :  { %v2797_v35 = vpack.c.bf16 %v1830_v31, %v1829_v30  ;;  %v388_v36 = vpop.f32.mrf.mxu0  ;;  %v773_v37 = vpop.f32.mrf.mxu1  ;;  %v1292_v38 = vmax.f32 %v857_v32, %v1206_v33  ;;  %v2708_v31 = vld [vmem:[%s3461_s0 + $0x250] sm:$0xff]  ;;  %v2733_v32 = vld [vmem:[%s3461_s0 + $0x318] sm:$0xff] }
 0x16f   :  { %v858_v40 = vmax.f32 %v388_v36, %v773_v37 }
 0x170   :  { %2870 = vst [vmem:[%s3463_s3 + $0x60] sm:$0xff] %v2797_v35   ;;  %v1727_v39 = vmax.f32 %v1292_v38, %v1641_v34 }
 0x172   :  { %v1781_v50 = vadd.f32 %v3072_v56, %v1727_v39 }
 0x174   :  { %v1831_v53 = vmax.f32 %v1781_v50, 0.0 }
 0x175   :  { %v1208_v41 = vpop.f32.mrf.mxu2  ;;  %v1643_v42 = vpop.f32.mrf.mxu3 }
 0x176   :  { %v1293_v45 = vmax.f32 %v858_v40, %v1208_v41  ;;  %v391_v46 = vpop.f32.mrf.mxu0  ;;  %v776_v47 = vpop.f32.mrf.mxu1 }
 0x177   :  { %v859_v55 = vmax.f32 %v391_v46, %v776_v47 }
 0x178   :  { %v1728_v51 = vmax.f32 %v1293_v45, %v1643_v42 }
 0x179   :  { %2101 = vmatmul.msk.bf16.gmra.mxu0 %vm229_vm2, %v2656_v43  ;;  %2276 = vmatmul.msk.bf16.gmra.mxu1 %vm229_vm2, %v2681_v44 }
 0x17a   :  { %v1782_v52 = vadd.f32 %v3072_v56, %v1728_v51  ;;  %2451 = vmatmul.msk.bf16.gmra.mxu2 %vm229_vm2, %v2706_v48  ;;  %2626 = vmatmul.msk.bf16.gmra.mxu3 %vm229_vm2, %v2731_v49 }
 0x17c   :  { %v1832_v54 = vmax.f32 %v1782_v52, 0.0 }
 0x17d   :  { %v1211_v57 = vpop.f32.mrf.mxu2  ;;  %v1646_v58 = vpop.f32.mrf.mxu3 }
 0x17e   :  { %v2802_v59 = vpack.c.bf16 %v1832_v54, %v1831_v53  ;;  %v393_v60 = vpop.f32.mrf.mxu0  ;;  %v778_v61 = vpop.f32.mrf.mxu1  ;;  %v1294_v62 = vmax.f32 %v859_v55, %v1211_v57 }
 0x17f   :  { %v860_v0 = vmax.f32 %v393_v60, %v778_v61 }
 0x180   :  { %2871 = vst [vmem:[%s3463_s3 + $0x68] sm:$0xff] %v2802_v59   ;;  %v1729_v63 = vmax.f32 %v1294_v62, %v1646_v58 }
 0x182   :  { %v1783_v10 = vadd.f32 %v3072_v56, %v1729_v63 }
 0x184   :  { %v1833_v13 = vmax.f32 %v1783_v10, 0.0 }
 0x185   :  { %v1213_v1 = vpop.f32.mrf.mxu2  ;;  %v1648_v2 = vpop.f32.mrf.mxu3 }
 0x186   :  { %v1295_v5 = vmax.f32 %v860_v0, %v1213_v1  ;;  %v396_v6 = vpop.f32.mrf.mxu0  ;;  %v781_v7 = vpop.f32.mrf.mxu1 }
 0x187   :  { %v861_v15 = vmax.f32 %v396_v6, %v781_v7 }
 0x188   :  { %v1730_v11 = vmax.f32 %v1295_v5, %v1648_v2 }
 0x189   :  { %2102 = vmatmul.msk.bf16.gmra.mxu0 %vm229_vm2, %v2657_v3  ;;  %2277 = vmatmul.msk.bf16.gmra.mxu1 %vm229_vm2, %v2682_v4 }
 0x18a   :  { %v1784_v12 = vadd.f32 %v3072_v56, %v1730_v11  ;;  %2452 = vmatmul.msk.bf16.gmra.mxu2 %vm229_vm2, %v2707_v8  ;;  %2627 = vmatmul.msk.bf16.gmra.mxu3 %vm229_vm2, %v2732_v9 }
 0x18c   :  { %v1834_v14 = vmax.f32 %v1784_v12, 0.0 }
 0x18d   :  { %v1216_v16 = vpop.f32.mrf.mxu2  ;;  %v1651_v17 = vpop.f32.mrf.mxu3 }
 0x18e   :  { %v2807_v18 = vpack.c.bf16 %v1834_v14, %v1833_v13  ;;  %v398_v19 = vpop.f32.mrf.mxu0  ;;  %v783_v20 = vpop.f32.mrf.mxu1  ;;  %v1296_v21 = vmax.f32 %v861_v15, %v1216_v16 }
 0x18f   :  { %v862_v23 = vmax.f32 %v398_v19, %v783_v20 }
 0x190   :  { %2872 = vst [vmem:[%s3463_s3 + $0x70] sm:$0xff] %v2807_v18   ;;  %v1731_v22 = vmax.f32 %v1296_v21, %v1651_v17 }
 0x192   :  { %v1785_v33 = vadd.f32 %v3072_v56, %v1731_v22 }
 0x194   :  { %v1835_v36 = vmax.f32 %v1785_v33, 0.0 }
 0x195   :  { %v1218_v24 = vpop.f32.mrf.mxu2  ;;  %v1653_v25 = vpop.f32.mrf.mxu3 }
 0x196   :  { %v1297_v28 = vmax.f32 %v862_v23, %v1218_v24  ;;  %v401_v29 = vpop.f32.mrf.mxu0  ;;  %v786_v30 = vpop.f32.mrf.mxu1 }
 0x197   :  { %v863_v38 = vmax.f32 %v401_v29, %v786_v30 }
 0x198   :  { %v1732_v34 = vmax.f32 %v1297_v28, %v1653_v25 }
 0x199   :  { %2103 = vmatmul.msk.bf16.gmra.mxu0 %vm229_vm2, %v2658_v26  ;;  %2278 = vmatmul.msk.bf16.gmra.mxu1 %vm229_vm2, %v2683_v27 }
 0x19a   :  { %v1786_v35 = vadd.f32 %v3072_v56, %v1732_v34  ;;  %2453 = vmatmul.msk.bf16.gmra.mxu2 %vm229_vm2, %v2708_v31  ;;  %2628 = vmatmul.msk.bf16.gmra.mxu3 %vm229_vm2, %v2733_v32 }
 0x19c   :  { %v1836_v37 = vmax.f32 %v1786_v35, 0.0 }
 0x19d   :  { %v1221_v39 = vpop.f32.mrf.mxu2  ;;  %v1656_v40 = vpop.f32.mrf.mxu3 }
 0x19e   :  { %v2812_v41 = vpack.c.bf16 %v1836_v37, %v1835_v36  ;;  %v403_v42 = vpop.f32.mrf.mxu0  ;;  %v788_v43 = vpop.f32.mrf.mxu1  ;;  %v1298_v44 = vmax.f32 %v863_v38, %v1221_v39 }
 0x19f   :  { %v864_v46 = vmax.f32 %v403_v42, %v788_v43 }
 0x1a0   :  { %2873 = vst [vmem:[%s3463_s3 + $0x78] sm:$0xff] %v2812_v41   ;;  %v1733_v45 = vmax.f32 %v1298_v44, %v1656_v40 }
 0x1a2   :  { %v1787_v52 = vadd.f32 %v3072_v56, %v1733_v45  ;;  %v3428_v45 = vld [vmem:[%s3462_s2] ss:$0 sm:$0xff] }
 0x1a4   :  { %v1837_v55 = vmax.f32 %v1787_v52, 0.0 }
 0x1a5   :  { %v1223_v47 = vpop.f32.mrf.mxu2  ;;  %v1658_v48 = vpop.f32.mrf.mxu3 }
 0x1a6   :  { %v1299_v49 = vmax.f32 %v864_v46, %v1223_v47  ;;  %v406_v50 = vpop.f32.mrf.mxu0  ;;  %v791_v51 = vpop.f32.mrf.mxu1 }
 0x1a7   :  { %v865_v58 = vmax.f32 %v406_v50, %v791_v51 }
 0x1a8   :  { %v1734_v53 = vmax.f32 %v1299_v49, %v1658_v48 }
 0x1aa   :  { %v1788_v54 = vadd.f32 %v3072_v56, %v1734_v53 }
 0x1ac   :  { %v1838_v57 = vmax.f32 %v1788_v54, 0.0 }
 0x1ad   :  { %v1226_v59 = vpop.f32.mrf.mxu2  ;;  %v1661_v60 = vpop.f32.mrf.mxu3 }
 0x1ae   :  { %v2817_v61 = vpack.c.bf16 %v1838_v57, %v1837_v55  ;;  %v408_v62 = vpop.f32.mrf.mxu0  ;;  %v793_v63 = vpop.f32.mrf.mxu1  ;;  %v1300_v0 = vmax.f32 %v865_v58, %v1226_v59 }
 0x1af   :  { %v866_v2 = vmax.f32 %v408_v62, %v793_v63 }
 0x1b0   :  { %2874 = vst [vmem:[%s3463_s3 + $0x80] sm:$0xff] %v2817_v61   ;;  %v1735_v1 = vmax.f32 %v1300_v0, %v1661_v60 }
 0x1b2   :  { %v1789_v8 = vadd.f32 %v3072_v56, %v1735_v1 }
 0x1b4   :  { %v1839_v11 = vmax.f32 %v1789_v8, 0.0 }
 0x1b5   :  { %v1228_v3 = vpop.f32.mrf.mxu2  ;;  %v1663_v4 = vpop.f32.mrf.mxu3 }
 0x1b6   :  { %v1301_v5 = vmax.f32 %v866_v2, %v1228_v3  ;;  %v411_v6 = vpop.f32.mrf.mxu0  ;;  %v796_v7 = vpop.f32.mrf.mxu1 }
 0x1b7   :  { %v867_v13 = vmax.f32 %v411_v6, %v796_v7 }
 0x1b8   :  { %v1736_v9 = vmax.f32 %v1301_v5, %v1663_v4 }
 0x1ba   :  { %v1790_v10 = vadd.f32 %v3072_v56, %v1736_v9 }
 0x1bc   :  { %v1840_v12 = vmax.f32 %v1790_v10, 0.0 }
 0x1bd   :  { %v1231_v14 = vpop.f32.mrf.mxu2  ;;  %v1666_v15 = vpop.f32.mrf.mxu3 }
 0x1be   :  { %v2822_v16 = vpack.c.bf16 %v1840_v12, %v1839_v11  ;;  %v413_v17 = vpop.f32.mrf.mxu0  ;;  %v798_v18 = vpop.f32.mrf.mxu1  ;;  %v1302_v19 = vmax.f32 %v867_v13, %v1231_v14 }
 0x1bf   :  { %v868_v21 = vmax.f32 %v413_v17, %v798_v18 }
 0x1c0   :  { %2875 = vst [vmem:[%s3463_s3 + $0x88] sm:$0xff] %v2822_v16   ;;  %v1737_v20 = vmax.f32 %v1302_v19, %v1666_v15 }
 0x1c2   :  { %v1791_v27 = vadd.f32 %v3072_v56, %v1737_v20 }
 0x1c4   :  { %v1841_v30 = vmax.f32 %v1791_v27, 0.0 }
 0x1c5   :  { %v1233_v22 = vpop.f32.mrf.mxu2  ;;  %v1668_v23 = vpop.f32.mrf.mxu3 }
 0x1c6   :  { %v1303_v24 = vmax.f32 %v868_v21, %v1233_v22  ;;  %v416_v25 = vpop.f32.mrf.mxu0  ;;  %v801_v26 = vpop.f32.mrf.mxu1 }
 0x1c7   :  { %v869_v32 = vmax.f32 %v416_v25, %v801_v26 }
 0x1c8   :  { %v1738_v28 = vmax.f32 %v1303_v24, %v1668_v23 }
 0x1ca   :  { %v1792_v29 = vadd.f32 %v3072_v56, %v1738_v28 }
 0x1cc   :  { %v1842_v31 = vmax.f32 %v1792_v29, 0.0 }
 0x1cd   :  { %v1236_v33 = vpop.f32.mrf.mxu2  ;;  %v1671_v34 = vpop.f32.mrf.mxu3 }
 0x1ce   :  { %v2827_v35 = vpack.c.bf16 %v1842_v31, %v1841_v30  ;;  %v418_v36 = vpop.f32.mrf.mxu0  ;;  %v803_v37 = vpop.f32.mrf.mxu1  ;;  %v1304_v38 = vmax.f32 %v869_v32, %v1236_v33 }
 0x1cf   :  { %v870_v40 = vmax.f32 %v418_v36, %v803_v37 }
 0x1d0   :  { %2876 = vst [vmem:[%s3463_s3 + $0x90] sm:$0xff] %v2827_v35   ;;  %v1739_v39 = vmax.f32 %v1304_v38, %v1671_v34 }
 0x1d2   :  { %v1793_v46 = vadd.f32 %v3428_v45, %v1739_v39 }
 0x1d4   :  { %v1843_v49 = vmax.f32 %v1793_v46, 0.0 }
 0x1d5   :  { %v1238_v41 = vpop.f32.mrf.mxu2  ;;  %v1673_v42 = vpop.f32.mrf.mxu3 }
 0x1d6   :  { %v1305_v43 = vmax.f32 %v870_v40, %v1238_v41  ;;  %v421_v44 = vpop.f32.mrf.mxu0  ;;  %v806_v56 = vpop.f32.mrf.mxu1 }
 0x1d7   :  { %v871_v51 = vmax.f32 %v421_v44, %v806_v56 }
 0x1d8   :  { %v1740_v47 = vmax.f32 %v1305_v43, %v1673_v42 }
 0x1da   :  { %v1794_v48 = vadd.f32 %v3428_v45, %v1740_v47 }
 0x1dc   :  { %v1844_v50 = vmax.f32 %v1794_v48, 0.0 }
 0x1dd   :  { %v1241_v52 = vpop.f32.mrf.mxu2  ;;  %v1676_v53 = vpop.f32.mrf.mxu3 }
 0x1de   :  { %v2832_v54 = vpack.c.bf16 %v1844_v50, %v1843_v49  ;;  %v423_v55 = vpop.f32.mrf.mxu0  ;;  %v808_v57 = vpop.f32.mrf.mxu1  ;;  %v1306_v58 = vmax.f32 %v871_v51, %v1241_v52 }
 0x1df   :  { %v872_v60 = vmax.f32 %v423_v55, %v808_v57 }
 0x1e0   :  { %2877 = vst [vmem:[%s3463_s3 + $0x98] sm:$0xff] %v2832_v54   ;;  %v1741_v59 = vmax.f32 %v1306_v58, %v1676_v53 }
 0x1e2   :  { %v1795_v2 = vadd.f32 %v3428_v45, %v1741_v59 }
 0x1e4   :  { %v1845_v5 = vmax.f32 %v1795_v2, 0.0 }
 0x1e5   :  { %v1243_v61 = vpop.f32.mrf.mxu2  ;;  %v1678_v62 = vpop.f32.mrf.mxu3 }
 0x1e6   :  { %v1307_v63 = vmax.f32 %v872_v60, %v1243_v61  ;;  %v426_v0 = vpop.f32.mrf.mxu0  ;;  %v811_v1 = vpop.f32.mrf.mxu1 }
 0x1e7   :  { %v873_v7 = vmax.f32 %v426_v0, %v811_v1 }
 0x1e8   :  { %v1742_v3 = vmax.f32 %v1307_v63, %v1678_v62 }
 0x1ea   :  { %v1796_v4 = vadd.f32 %v3428_v45, %v1742_v3 }
 0x1ec   :  { %v1846_v6 = vmax.f32 %v1796_v4, 0.0 }
 0x1ed   :  { %v1246_v8 = vpop.f32.mrf.mxu2  ;;  %v1681_v9 = vpop.f32.mrf.mxu3 }
 0x1ee   :  { %v2837_v10 = vpack.c.bf16 %v1846_v6, %v1845_v5  ;;  %v428_v11 = vpop.f32.mrf.mxu0  ;;  %v813_v12 = vpop.f32.mrf.mxu1  ;;  %v1308_v13 = vmax.f32 %v873_v7, %v1246_v8 }
 0x1ef   :  { %v874_v15 = vmax.f32 %v428_v11, %v813_v12 }
 0x1f0   :  { %2878 = vst [vmem:[%s3463_s3 + $0xa0] sm:$0xff] %v2837_v10   ;;  %v1743_v14 = vmax.f32 %v1308_v13, %v1681_v9 }
 0x1f2   :  { %v1797_v21 = vadd.f32 %v3428_v45, %v1743_v14 }
 0x1f4   :  { %v1847_v24 = vmax.f32 %v1797_v21, 0.0 }
 0x1f5   :  { %v1248_v16 = vpop.f32.mrf.mxu2  ;;  %v1683_v17 = vpop.f32.mrf.mxu3 }
 0x1f6   :  { %v1309_v18 = vmax.f32 %v874_v15, %v1248_v16  ;;  %v431_v19 = vpop.f32.mrf.mxu0  ;;  %v816_v20 = vpop.f32.mrf.mxu1 }
 0x1f7   :  { %v875_v26 = vmax.f32 %v431_v19, %v816_v20 }
 0x1f8   :  { %v1744_v22 = vmax.f32 %v1309_v18, %v1683_v17 }
 0x1fa   :  { %v1798_v23 = vadd.f32 %v3428_v45, %v1744_v22 }
 0x1fc   :  { %v1848_v25 = vmax.f32 %v1798_v23, 0.0 }
 0x1fd   :  { %v1251_v27 = vpop.f32.mrf.mxu2  ;;  %v1686_v28 = vpop.f32.mrf.mxu3 }
 0x1fe   :  { %v2842_v29 = vpack.c.bf16 %v1848_v25, %v1847_v24  ;;  %v433_v30 = vpop.f32.mrf.mxu0  ;;  %v818_v31 = vpop.f32.mrf.mxu1  ;;  %v1310_v32 = vmax.f32 %v875_v26, %v1251_v27 }
 0x1ff   :  { %v876_v34 = vmax.f32 %v433_v30, %v818_v31 }
 0x200   :  { %2879 = vst [vmem:[%s3463_s3 + $0xa8] sm:$0xff] %v2842_v29   ;;  %v1745_v33 = vmax.f32 %v1310_v32, %v1686_v28 }
 0x202   :  { %v1799_v40 = vadd.f32 %v3428_v45, %v1745_v33 }
 0x204   :  { %v1849_v43 = vmax.f32 %v1799_v40, 0.0 }
 0x205   :  { %v1253_v35 = vpop.f32.mrf.mxu2  ;;  %v1688_v36 = vpop.f32.mrf.mxu3 }
 0x206   :  { %v1311_v37 = vmax.f32 %v876_v34, %v1253_v35  ;;  %v436_v38 = vpop.f32.mrf.mxu0  ;;  %v821_v39 = vpop.f32.mrf.mxu1 }
 0x207   :  { %v877_v56 = vmax.f32 %v436_v38, %v821_v39 }
 0x208   :  { %v1746_v41 = vmax.f32 %v1311_v37, %v1688_v36 }
 0x20a   :  { %v1800_v42 = vadd.f32 %v3428_v45, %v1746_v41 }
 0x20c   :  { %v1850_v44 = vmax.f32 %v1800_v42, 0.0 }
 0x20d   :  { %v1256_v46 = vpop.f32.mrf.mxu2  ;;  %v1691_v47 = vpop.f32.mrf.mxu3 }
 0x20e   :  { %v2847_v48 = vpack.c.bf16 %v1850_v44, %v1849_v43  ;;  %v438_v49 = vpop.f32.mrf.mxu0  ;;  %v823_v50 = vpop.f32.mrf.mxu1  ;;  %v1312_v51 = vmax.f32 %v877_v56, %v1256_v46 }
 0x20f   :  { %v878_v53 = vmax.f32 %v438_v49, %v823_v50 }
 0x210   :  { %2880 = vst [vmem:[%s3463_s3 + $0xb0] sm:$0xff] %v2847_v48   ;;  %v1747_v52 = vmax.f32 %v1312_v51, %v1691_v47 }
 0x212   :  { %v1801_v60 = vadd.f32 %v3428_v45, %v1747_v52 }
 0x214   :  { %v1851_v63 = vmax.f32 %v1801_v60, 0.0 }
 0x215   :  { %v1258_v54 = vpop.f32.mrf.mxu2  ;;  %v1693_v55 = vpop.f32.mrf.mxu3 }
 0x216   :  { %v1313_v57 = vmax.f32 %v878_v53, %v1258_v54  ;;  %v441_v58 = vpop.f32.mrf.mxu0  ;;  %v826_v59 = vpop.f32.mrf.mxu1 }
 0x217   :  { %v879_v1 = vmax.f32 %v441_v58, %v826_v59 }
 0x218   :  { %v1748_v61 = vmax.f32 %v1313_v57, %v1693_v55 }
 0x21a   :  { %v1802_v62 = vadd.f32 %v3428_v45, %v1748_v61 }
 0x21c   :  { %v1852_v0 = vmax.f32 %v1802_v62, 0.0 }
 0x21d   :  { %v1261_v2 = vpop.f32.mrf.mxu2  ;;  %v1696_v3 = vpop.f32.mrf.mxu3 }
 0x21e   :  { %v2852_v4 = vpack.c.bf16 %v1852_v0, %v1851_v63  ;;  %v1314_v5 = vmax.f32 %v879_v1, %v1261_v2  ;;  %v443_v6 = vpop.f32.mrf.mxu0  ;;  %v828_v7 = vpop.f32.mrf.mxu1 }
 0x21f   :  { %v880_v9 = vmax.f32 %v443_v6, %v828_v7 }
 0x220   :  { %2881 = vst [vmem:[%s3463_s3 + $0xb8] sm:$0xff] %v2852_v4   ;;  %v1749_v8 = vmax.f32 %v1314_v5, %v1696_v3 }
 0x222   :  { %v1803_v13 = vadd.f32 %v3428_v45, %v1749_v8 }
 0x224   :  { %v1853_v16 = vmax.f32 %v1803_v13, 0.0 }
 0x225   :  { %v1263_v10 = vpop.f32.mrf.mxu2  ;;  %v1698_v12 = vpop.f32.mrf.mxu3 }
 0x226   :  { %v1315_v11 = vmax.f32 %v880_v9, %v1263_v10 }
 0x228   :  { %v1750_v14 = vmax.f32 %v1315_v11, %v1698_v12 }
 0x22a   :  { %v1804_v15 = vadd.f32 %v3428_v45, %v1750_v14 }
 0x22c   :  { %v1854_v17 = vmax.f32 %v1804_v15, 0.0 }
 0x22e   :  { %v2857_v18 = vpack.c.bf16 %v1854_v17, %v1853_v16 }
 0x230   :  { %2882 = vst [vmem:[%s3463_s3 + $0xc0] sm:$0xff] %v2857_v18  }

// kernel: net_forward.4
= control target key start
LH: loop header
LB: loop body
LE: loop exit
PB: predicated region body
PF: predicated region fallthrough
CT: control target
= control target key end

     0   :  { %vm148_vm0 = vcmask 1042432   ;;  %vm135_vm1 = vcmask 179200   ;;  %s1243_s1 = inlined_call_operand.vmem [shape: bf16[150,128], index: 1, kind: input, shape index: {}]   ;;  %s1244_s0 = inlined_call_operand.vmem [shape: bf16[4,64,150], index: 0, kind: input, shape index: {}]   ;;  %s1245_s2 = inlined_call_operand.vmem [shape: f32[1,128], index: 2, kind: input, shape index: {}]   ;;  %s1246_s3 = inlined_call_operand.vmem [shape: bf16[64,128], index: 3, kind: output, shape index: {}]  }
   0x1   :  { %v911_v0 = vld [vmem:[%s1243_s1 + $0x38] sm:$0xff]  ;;  %v33_v1 = vld [vmem:[%s1243_s1 + $0x48] sm:$0x7]  ;;  %v921_v3 = vld [vmem:[%s1243_s1 + $0x30] sm:$0xff] }
   0x2   :  { %v115_v2 = vunpack.c.l.b16 %v33_v1  ;;  %152 = vmatpush.bf16.msra.mxu0 %v911_v0  ;;  %267 = vmatpush.bf16.msra.mxu2 %v911_v0  ;;  %v831_v6 = vld [vmem:[%s1243_s1 + $0x40] sm:$0xff]  ;;  %v930_v7 = vld [vmem:[%s1243_s1 + $0x28] sm:$0xff]  ;;  %v826_v15 = vld [vmem:[%s1243_s1 + $0x18] sm:$0xff] }
   0x3   :  { %v840_v8 = vld [vmem:[%s1244_s0 + $0x44] sm:$0xf]  ;;  %v703_v9 = vld [vmem:[%s1244_s0 + $0x48] sm:$0xf0]  ;;  %v825_v16 = vld [vmem:[%s1243_s1 + $0x10] sm:$0xff] }
   0x4   :  { %v125_v4 = vpack.c.b16 %v115_v2, %v115_v2  ;;  %v832_v10 = vld [vmem:[%s1244_s0 + $0x4] sm:$0xf]  ;;  %v623_v11 = vld [vmem:[%s1244_s0 + $0x8] sm:$0xf0]  ;;  %v706_v12 = vor.u32 %v840_v8, %v703_v9  ;;  %v842_v18 = vld [vmem:[%s1244_s0 + $0x54] sm:$0xf] }
   0x5   :  { %v827_v13 = vld [vmem:[%s1243_s1 + $0x20] sm:$0xff]  ;;  %v626_v14 = vor.u32 %v832_v10, %v623_v11  ;;  %v824_v17 = vld [vmem:[%s1243_s1 + $0x8] sm:$0xff]  ;;  %v711_v19 = vld [vmem:[%s1244_s0 + $0x58] sm:$0xf0] }
   0x6   :  { %v150_v5 = vsel %vm148_vm0, %v125_v4, 0  ;;  %153 = vmatpush.bf16.msra.mxu0 %v921_v3  ;;  %268 = vmatpush.bf16.msra.mxu2 %v921_v3  ;;  %v834_v20 = vld [vmem:[%s1244_s0 + $0x14] sm:$0xf]  ;;  %v631_v21 = vld [vmem:[%s1244_s0 + $0x18] sm:$0xf0]  ;;  %v714_v22 = vor.u32 %v842_v18, %v711_v19  ;;  %v823_v23 = vld [vmem:[%s1243_s1] sm:$0xff] }
   0x7   :  { %302 = vmatpush.bf16.msra.mxu3 %v150_v5  ;;  %187 = vmatpush.bf16.msra.mxu1 %v150_v5  ;;  %v621_v24 = vld [vmem:[%s1244_s0] sm:$0xf]  ;;  %v833_v25 = vld [vmem:[%s1244_s0 + $0x4] sm:$0xf0]  ;;  %v634_v26 = vor.u32 %v834_v20, %v631_v21  ;;  %v844_v31 = vld [vmem:[%s1244_s0 + $0x64] sm:$0xf] }
   0x8   :  { %v701_v27 = vld [vmem:[%s1244_s0 + $0x40] sm:$0xf]  ;;  %v841_v28 = vld [vmem:[%s1244_s0 + $0x44] sm:$0xf0]  ;;  %v622_v29 = vor.u32 %v833_v25, %v621_v24  ;;  %v719_v32 = vld [vmem:[%s1244_s0 + $0x68] sm:$0xf0] }
   0x9   :  { %v702_v30 = vor.u32 %v841_v28, %v701_v27  ;;  %v836_v33 = vld [vmem:[%s1244_s0 + $0x24] sm:$0xf]  ;;  %v639_v34 = vld [vmem:[%s1244_s0 + $0x28] sm:$0xf0]  ;;  %v722_v35 = vor.u32 %v844_v31, %v719_v32  ;;  %v629_v36 = vld [vmem:[%s1244_s0 + $0x10] sm:$0xf] }
   0xa   :  { %154 = vmatpush.bf16.msra.mxu0 %v930_v7  ;;  %269 = vmatpush.bf16.msra.mxu2 %v930_v7  ;;  %v835_v37 = vld [vmem:[%s1244_s0 + $0x14] sm:$0xf0]  ;;  %v642_v38 = vor.u32 %v836_v33, %v639_v34  ;;  %v709_v39 = vld [vmem:[%s1244_s0 + $0x50] sm:$0xf]  ;;  %v846_v43 = vld [vmem:[%s1244_s0 + $0x74] sm:$0xf] }
   0xb   :  { %303 = vmatpush.bf16.msra.mxu3 %v831_v6  ;;  %188 = vmatpush.bf16.msra.mxu1 %v831_v6  ;;  %v843_v40 = vld [vmem:[%s1244_s0 + $0x54] sm:$0xf0]  ;;  %v630_v41 = vor.u32 %v835_v37, %v629_v36  ;;  %v727_v44 = vld [vmem:[%s1244_s0 + $0x78] sm:$0xf0]  ;;  %v838_v45 = vld [vmem:[%s1244_s0 + $0x34] sm:$0xf] }
   0xc   :  { %v710_v42 = vor.u32 %v843_v40, %v709_v39  ;;  %v647_v46 = vld [vmem:[%s1244_s0 + $0x38] sm:$0xf0]  ;;  %v730_v47 = vor.u32 %v846_v43, %v727_v44  ;;  %v637_v48 = vld [vmem:[%s1244_s0 + $0x20] sm:$0xf]  ;;  %v837_v49 = vld [vmem:[%s1244_s0 + $0x24] sm:$0xf0] }
   0xd   :  { %v650_v50 = vor.u32 %v838_v45, %v647_v46  ;;  %v717_v51 = vld [vmem:[%s1244_s0 + $0x60] sm:$0xf]  ;;  %v845_v52 = vld [vmem:[%s1244_s0 + $0x64] sm:$0xf0]  ;;  %v638_v53 = vor.u32 %v837_v49, %v637_v48  ;;  %v848_v55 = vld [vmem:[%s1244_s0 + $0x84] sm:$0xf] }
   0xe   :  { %731 = vmatmul.msk.bf16.vlgmr.msra.gmra.mxu3 %vm135_vm1, %v706_v12  ;;  %155 = vmatpush.bf16.msra.mxu0 %v827_v13  ;;  %v718_v54 = vor.u32 %v845_v52, %v717_v51  ;;  %v747_v56 = vld [vmem:[%s1244_s0 + $0x88] sm:$0xf0]  ;;  %v745_v57 = vld [vmem:[%s1244_s0 + $0x80] sm:$0xf]  ;;  %v849_v58 = vld [vmem:[%s1244_s0 + $0x84] sm:$0xf0] }
   0xf   :  { %425 = vmatpush.bf16.msrb.mxu3 %v150_v5  ;;  %390 = vmatpush.bf16.msrb.mxu1 %v911_v0  ;;  %v750_v59 = vor.u32 %v848_v55, %v747_v56  ;;  %v645_v60 = vld [vmem:[%s1244_s0 + $0x30] sm:$0xf]  ;;  %v839_v61 = vld [vmem:[%s1244_s0 + $0x34] sm:$0xf0]  ;;  %v746_v62 = vor.u32 %v849_v58, %v745_v57  ;;  %v755_v4 = vld [vmem:[%s1244_s0 + $0x98] sm:$0xf0] }
  0x10   :  { %687 = vmatmul.msk.bf16.vlgmr.msra.gmra.mxu1 %vm135_vm1, %v626_v14  ;;  %270 = vmatpush.bf16.msra.mxu2 %v827_v13  ;;  %v725_v63 = vld [vmem:[%s1244_s0 + $0x70] sm:$0xf]  ;;  %v646_v1 = vor.u32 %v839_v61, %v645_v60  ;;  %v789_v8 = vld [vmem:[%s1244_s0 + $0xc0] sm:$0xf]  ;;  %v857_v9 = vld [vmem:[%s1244_s0 + $0xc4] sm:$0xf0] }
  0x11   :  { %v856_v11 = vld [vmem:[%s1244_s0 + $0xc4] sm:$0xf]  ;;  %v791_v12 = vld [vmem:[%s1244_s0 + $0xc8] sm:$0xf0]  ;;  %v853_v18 = vld [vmem:[%s1244_s0 + $0xa4] sm:$0xf0] }
  0x12   :  { %156 = vmatpush.bf16.msra.mxu0 %v826_v15  ;;  %v794_v14 = vor.u32 %v856_v11, %v791_v12  ;;  %v797_v20 = vld [vmem:[%s1244_s0 + $0xd0] sm:$0xf]  ;;  %v859_v21 = vld [vmem:[%s1244_s0 + $0xd4] sm:$0xf0]  ;;  %v799_v24 = vld [vmem:[%s1244_s0 + $0xd8] sm:$0xf0] }
  0x13   :  { %391 = vmatpush.bf16.msrb.mxu1 %v921_v3  ;;  %426 = vmatpush.bf16.msrb.mxu3 %v831_v6  ;;  %v798_v25 = vor.u32 %v859_v21, %v797_v20  ;;  %v854_v27 = vld [vmem:[%s1244_s0 + $0xb4] sm:$0xf]  ;;  %v771_v28 = vld [vmem:[%s1244_s0 + $0xb8] sm:$0xf0]  ;;  %v805_v32 = vld [vmem:[%s1244_s0 + $0xe0] sm:$0xf] }
  0x14   :  { %271 = vmatpush.bf16.msra.mxu2 %v826_v15  ;;  %v774_v31 = vor.u32 %v854_v27, %v771_v28  ;;  %v861_v33 = vld [vmem:[%s1244_s0 + $0xe4] sm:$0xf0]  ;;  %v807_v36 = vld [vmem:[%s1244_s0 + $0xe8] sm:$0xf0]  ;;  %v813_v39 = vld [vmem:[%s1244_s0 + $0xf0] sm:$0xf] }
  0x15   :  { %v806_v37 = vor.u32 %v861_v33, %v805_v32  ;;  %v863_v40 = vld [vmem:[%s1244_s0 + $0xf4] sm:$0xf0]  ;;  %v815_v43 = vld [vmem:[%s1244_s0 + $0xf8] sm:$0xf0] }
  0x16   :  { %157 = vmatpush.bf16.msra.mxu0 %v825_v16  ;;  %v814_v44 = vor.u32 %v863_v40, %v813_v39 }
  0x17   :  { %392 = vmatpush.bf16.msrb.mxu1 %v930_v7 }
  0x18   :  { %272 = vmatpush.bf16.msra.mxu2 %v825_v16 }
  0x1a   :  { %158 = vmatpush.bf16.msra.mxu0 %v824_v17 }
  0x1b   :  { %393 = vmatpush.bf16.msrb.mxu1 %v827_v13 }
  0x1c   :  { %273 = vmatpush.bf16.msra.mxu2 %v824_v17 }
  0x1e   :  { %732 = vmatmul.msk.bf16.gmra.mxu3 %vm135_vm1, %v714_v22  ;;  %159 = vmatpush.bf16.msra.mxu0 %v823_v23 }
  0x1f   :  { %394 = vmatpush.bf16.msrb.mxu1 %v826_v15 }
  0x20   :  { %688 = vmatmul.msk.bf16.gmra.mxu1 %vm135_vm1, %v634_v26  ;;  %274 = vmatpush.bf16.msra.mxu2 %v823_v23 }
  0x21   :  { %160 = vmatmul.bf16.vlgmr.msra.gmra.mxu0 %v622_v29  ;;  %v769_v29 = vld [vmem:[%s1244_s0 + $0xb0] sm:$0xf] }
  0x22   :  { %513 = vmatpush.bf16.msrb.mxu0 %v911_v0  ;;  %v847_v0 = vld [vmem:[%s1244_s0 + $0x74] sm:$0xf0] }
  0x23   :  { %395 = vmatpush.bf16.msrb.mxu1 %v825_v16  ;;  %275 = vmatmul.bf16.vlgmr.msra.gmra.mxu2 %v702_v30  ;;  %v726_v2 = vor.u32 %v847_v0, %v725_v63  ;;  %v855_v30 = vld [vmem:[%s1244_s0 + $0xb4] sm:$0xf0] }
  0x24   :  { %548 = vmatpush.bf16.msrb.mxu2 %v150_v5  ;;  %v753_v5 = vld [vmem:[%s1244_s0 + $0x90] sm:$0xf]  ;;  %v770_v34 = vor.u32 %v855_v30, %v769_v29 }
  0x26   :  { %514 = vmatpush.bf16.msrb.mxu0 %v921_v3  ;;  %v850_v3 = vld [vmem:[%s1244_s0 + $0x94] sm:$0xf] }
  0x27   :  { %396 = vmatpush.bf16.msrb.mxu1 %v824_v17 }
  0x28   :  { %549 = vmatpush.bf16.msrb.mxu2 %v831_v6  ;;  %v851_v6 = vld [vmem:[%s1244_s0 + $0x94] sm:$0xf0] }
  0x29   :  { %v754_v10 = vor.u32 %v851_v6, %v753_v5 }
  0x2a   :  { %515 = vmatpush.bf16.msrb.mxu0 %v930_v7  ;;  %v758_v7 = vor.u32 %v850_v3, %v755_v4 }
  0x2b   :  { %397 = vmatpush.bf16.msrb.mxu1 %v823_v23 }
  0x2e   :  { %516 = vmatpush.bf16.msrb.mxu0 %v827_v13  ;;  %733 = vmatmul.msk.bf16.gmra.mxu3 %vm135_vm1, %v722_v35  ;;  %v790_v13 = vor.u32 %v857_v9, %v789_v8  ;;  %v860_v35 = vld [vmem:[%s1244_s0 + $0xe4] sm:$0xf] }
  0x30   :  { %689 = vmatmul.msk.bf16.gmra.mxu1 %vm135_vm1, %v642_v38  ;;  %v810_v38 = vor.u32 %v860_v35, %v807_v36 }
  0x31   :  { %165 = vmatmul.bf16.gmra.mxu0 %v630_v41 }
  0x32   :  { %517 = vmatpush.bf16.msrb.mxu0 %v826_v15  ;;  %v852_v15 = vld [vmem:[%s1244_s0 + $0xa4] sm:$0xf] }
  0x33   :  { %280 = vmatmul.bf16.gmra.mxu2 %v710_v42  ;;  %v862_v42 = vld [vmem:[%s1244_s0 + $0xf4] sm:$0xf] }
  0x34   :  { %v818_v45 = vor.u32 %v862_v42, %v815_v43  ;;  %v1205_v42 = vld [vmem:[%s1245_s2] ss:$0 sm:$0xff] }
  0x36   :  { %518 = vmatpush.bf16.msrb.mxu0 %v825_v16  ;;  %v763_v16 = vld [vmem:[%s1244_s0 + $0xa8] sm:$0xf0] }
  0x37   :  { %v766_v19 = vor.u32 %v852_v15, %v763_v16 }
  0x3a   :  { %519 = vmatpush.bf16.msrb.mxu0 %v824_v17  ;;  %v761_v17 = vld [vmem:[%s1244_s0 + $0xa0] sm:$0xf] }
  0x3b   :  { %v762_v22 = vor.u32 %v853_v18, %v761_v17 }
  0x3e   :  { %520 = vmatpush.bf16.msrb.mxu0 %v823_v23  ;;  %734 = vmatmul.msk.bf16.gmra.mxu3 %vm135_vm1, %v730_v47  ;;  %v858_v23 = vld [vmem:[%s1244_s0 + $0xd4] sm:$0xf] }
  0x3f   :  { %v802_v26 = vor.u32 %v858_v23, %v799_v24 }
  0x40   :  { %690 = vmatmul.msk.bf16.gmra.mxu1 %vm135_vm1, %v650_v50 }
  0x41   :  { %170 = vmatmul.bf16.gmra.mxu0 %v638_v53 }
  0x43   :  { %285 = vmatmul.bf16.gmra.mxu2 %v718_v54 }
  0x4e   :  { %775 = vmatmul.msk.bf16.vlgmr.msrb.gmra.mxu3 %vm135_vm1, %v750_v59 }
  0x50   :  { %398 = vmatmul.bf16.vlgmr.msrb.gmra.mxu1 %v746_v62 }
  0x51   :  { %175 = vmatmul.bf16.gmra.mxu0 %v646_v1 }
  0x53   :  { %290 = vmatmul.bf16.gmra.mxu2 %v726_v2 }
  0x5e   :  { %776 = vmatmul.msk.bf16.gmra.mxu3 %vm135_vm1, %v758_v7 }
  0x60   :  { %403 = vmatmul.bf16.gmra.mxu1 %v754_v10 }
  0x61   :  { %521 = vmatmul.bf16.vlgmr.msrb.gmra.mxu0 %v790_v13 }
  0x63   :  { %819 = vmatmul.msk.bf16.vlgmr.msrb.gmra.mxu2 %vm135_vm1, %v794_v14 }
  0x6e   :  { %777 = vmatmul.msk.bf16.gmra.mxu3 %vm135_vm1, %v766_v19 }
  0x70   :  { %408 = vmatmul.bf16.gmra.mxu1 %v762_v22 }
  0x71   :  { %526 = vmatmul.bf16.gmra.mxu0 %v798_v25 }
  0x73   :  { %820 = vmatmul.msk.bf16.gmra.mxu2 %vm135_vm1, %v802_v26 }
  0x7e   :  { %778 = vmatmul.msk.bf16.gmra.mxu3 %vm135_vm1, %v774_v31 }
  0x80   :  { %413 = vmatmul.bf16.gmra.mxu1 %v770_v34 }
  0x81   :  { %531 = vmatmul.bf16.gmra.mxu0 %v806_v37 }
  0x83   :  { %821 = vmatmul.msk.bf16.gmra.mxu2 %vm135_vm1, %v810_v38 }
  0x8d   :  { %v190_v41 = vpop.f32.mrf.mxu1 }
  0x91   :  { %v305_v46 = vpop.f32.mrf.mxu3  ;;  %536 = vmatmul.bf16.gmra.mxu0 %v814_v44 }
  0x93   :  { %822 = vmatmul.msk.bf16.gmra.mxu2 %vm135_vm1, %v818_v45 }
  0x95   :  { %v192_v47 = vpop.f32.mrf.mxu1 }
  0x99   :  { %v307_v48 = vpop.f32.mrf.mxu3 }
  0x9d   :  { %v195_v49 = vpop.f32.mrf.mxu1 }
  0x9e   :  { %v161_v50 = vpop.f32.mrf.mxu0 }
  0x9f   :  { %v191_v51 = vadd.f32 %v190_v41, %v161_v50 }
  0xa1   :  { %v310_v52 = vpop.f32.mrf.mxu3 }
  0xa5   :  { %v1164_v53 = vpop.f32.mrf.mxu1 }
  0xa6   :  { %v276_v54 = vpop.f32.mrf.mxu2  ;;  %v163_v56 = vpop.f32.mrf.mxu0 }
  0xa7   :  { %v306_v55 = vadd.f32 %v305_v46, %v276_v54  ;;  %v193_v37 = vadd.f32 %v192_v47, %v163_v56 }
  0xa9   :  { %v325_v57 = vmax.f32 %v191_v51, %v306_v55  ;;  %v1166_v58 = vpop.f32.mrf.mxu3 }
  0xad   :  { %v200_v59 = vpop.f32.mrf.mxu1 }
  0xae   :  { %v278_v60 = vpop.f32.mrf.mxu2  ;;  %v166_v61 = vpop.f32.mrf.mxu0 }
  0xaf   :  { %v1168_v62 = vadd.f32 %v195_v49, %v166_v61  ;;  %v308_v35 = vadd.f32 %v307_v48, %v278_v60 }
  0xb1   :  { %v315_v63 = vpop.f32.mrf.mxu3  ;;  %v326_v40 = vmax.f32 %v193_v37, %v308_v35 }
  0xb5   :  { %v1170_v0 = vpop.f32.mrf.mxu1 }
  0xb6   :  { %v281_v1 = vpop.f32.mrf.mxu2  ;;  %v168_v3 = vpop.f32.mrf.mxu0 }
  0xb7   :  { %v1172_v2 = vadd.f32 %v310_v52, %v281_v1  ;;  %v198_v1 = vadd.f32 %v1164_v53, %v168_v3 }
  0xb9   :  { %v327_v4 = vmax.f32 %v1168_v62, %v1172_v2  ;;  %v1176_v5 = vpop.f32.mrf.mxu3 }
  0xbd   :  { %v205_v6 = vpop.f32.mrf.mxu1 }
  0xbe   :  { %v283_v7 = vpop.f32.mrf.mxu2  ;;  %v171_v8 = vpop.f32.mrf.mxu0 }
  0xbf   :  { %v1178_v9 = vadd.f32 %v200_v59, %v171_v8  ;;  %v313_v60 = vadd.f32 %v1166_v58, %v283_v7 }
  0xc1   :  { %v320_v10 = vpop.f32.mrf.mxu3  ;;  %v328_v8 = vmax.f32 %v198_v1, %v313_v60 }
  0xc5   :  { %v1184_v14 = vpop.f32.mrf.mxu1 }
  0xc6   :  { %v286_v11 = vpop.f32.mrf.mxu2  ;;  %v1182_v13 = vpop.f32.mrf.mxu0 }
  0xc7   :  { %v1180_v12 = vadd.f32 %v315_v63, %v286_v11 }
  0xc9   :  { %v329_v15 = vmax.f32 %v1178_v9, %v1180_v12  ;;  %v1188_v16 = vpop.f32.mrf.mxu3 }
  0xcd   :  { %v399_v20 = vpop.f32.mrf.mxu1 }
  0xce   :  { %v1190_v17 = vpop.f32.mrf.mxu2  ;;  %v176_v18 = vpop.f32.mrf.mxu0 }
  0xcf   :  { %v1192_v19 = vadd.f32 %v205_v6, %v176_v18  ;;  %v318_v3 = vadd.f32 %v1176_v5, %v1190_v17 }
  0xd1   :  { %v428_v21 = vpop.f32.mrf.mxu3 }
  0xd2   :  { %v429_v33 = vadd.f32 %v428_v21, %v399_v20 }
  0xd4   :  { %v448_v38 = vmax.f32 %v325_v57, %v429_v33 }
  0xd5   :  { %v401_v26 = vpop.f32.mrf.mxu1 }
  0xd6   :  { %v291_v22 = vpop.f32.mrf.mxu2  ;;  %v1196_v24 = vpop.f32.mrf.mxu0 }
  0xd7   :  { %v1194_v23 = vadd.f32 %v320_v10, %v291_v22 }
  0xd9   :  { %v331_v25 = vmax.f32 %v1192_v19, %v1194_v23  ;;  %v430_v27 = vpop.f32.mrf.mxu3 }
  0xda   :  { %v431_v39 = vadd.f32 %v430_v27, %v401_v26 }
  0xdc   :  { %v449_v44 = vmax.f32 %v326_v40, %v431_v39 }
  0xdd   :  { %v404_v30 = vpop.f32.mrf.mxu1 }
  0xde   :  { %v1200_v28 = vpop.f32.mrf.mxu2  ;;  %v522_v29 = vpop.f32.mrf.mxu0 }
  0xe1   :  { %v433_v31 = vpop.f32.mrf.mxu3 }
  0xe2   :  { %v434_v56 = vadd.f32 %v433_v31, %v404_v30 }
  0xe4   :  { %v450_v2 = vmax.f32 %v327_v4, %v434_v56 }
  0xe5   :  { %v406_v45 = vpop.f32.mrf.mxu1 }
  0xe6   :  { %v551_v32 = vpop.f32.mrf.mxu2  ;;  %v524_v34 = vpop.f32.mrf.mxu0 }
  0xe7   :  { %v552_v36 = vadd.f32 %v551_v32, %v522_v29 }
  0xe9   :  { %v571_v41 = vmax.f32 %v448_v38, %v552_v36  ;;  %v435_v50 = vpop.f32.mrf.mxu3 }
  0xea   :  { %v436_v6 = vadd.f32 %v435_v50, %v406_v45 }
  0xeb   :  { %v583_v51 = vadd.f32 %v1205_v42, %v571_v41 }
  0xec   :  { %v451_v18 = vmax.f32 %v328_v8, %v436_v6 }
  0xed   :  { %v591_v52 = vmax.f32 %v583_v51, 0.0  ;;  %v409_v61 = vpop.f32.mrf.mxu1  ;;  %v323_v51 = vadd.f32 %v1188_v16, %v1200_v28 }
  0xee   :  { %v553_v43 = vpop.f32.mrf.mxu2  ;;  %v527_v49 = vpop.f32.mrf.mxu0 }
  0xef   :  { %v554_v46 = vadd.f32 %v553_v43, %v524_v34  ;;  %v203_v34 = vadd.f32 %v1170_v0, %v1182_v13 }
  0xf1   :  { %v572_v48 = vmax.f32 %v449_v44, %v554_v46  ;;  %v438_v63 = vpop.f32.mrf.mxu3  ;;  %v330_v37 = vmax.f32 %v203_v34, %v318_v3 }
  0xf2   :  { %v439_v32 = vadd.f32 %v438_v63, %v409_v61 }
  0xf3   :  { %v584_v47 = vadd.f32 %v1205_v42, %v572_v48 }
  0xf4   :  { %v452_v35 = vmax.f32 %v329_v15, %v439_v32 }
  0xf5   :  { %v592_v54 = vmax.f32 %v584_v47, 0.0  ;;  %v411_v7 = vpop.f32.mrf.mxu1  ;;  %v208_v47 = vadd.f32 %v1184_v14, %v1196_v24 }
  0xf6   :  { %v556_v55 = vpop.f32.mrf.mxu2  ;;  %v529_v59 = vpop.f32.mrf.mxu0 }
  0xf7   :  { %v867_v57 = vpack.c.bf16 %v592_v54, %v591_v52  ;;  %v557_v62 = vadd.f32 %v556_v55, %v527_v49  ;;  %v332_v55 = vmax.f32 %v208_v47, %v323_v51 }
  0xf9   :  { %868 = vst [vmem:[%s1246_s3] sm:$0xff] %v867_v57   ;;  %v573_v10 = vmax.f32 %v450_v2, %v557_v62  ;;  %v440_v27 = vpop.f32.mrf.mxu3 }
  0xfa   :  { %v441_v36 = vadd.f32 %v440_v27, %v411_v7 }
  0xfb   :  { %v585_v22 = vadd.f32 %v1205_v42, %v573_v10 }
  0xfc   :  { %v453_v5 = vmax.f32 %v330_v37, %v441_v36 }
  0xfd   :  { %v593_v29 = vmax.f32 %v585_v22, 0.0  ;;  %v414_v38 = vpop.f32.mrf.mxu1 }
  0xfe   :  { %v558_v11 = vpop.f32.mrf.mxu2  ;;  %v532_v21 = vpop.f32.mrf.mxu0 }
  0xff   :  { %v559_v20 = vadd.f32 %v558_v11, %v529_v59 }
 0x101   :  { %v574_v58 = vmax.f32 %v451_v18, %v559_v20  ;;  %v443_v40 = vpop.f32.mrf.mxu3 }
 0x102   :  { %v444_v50 = vadd.f32 %v443_v40, %v414_v38 }
 0x103   :  { %v586_v26 = vadd.f32 %v1205_v42, %v574_v58 }
 0x104   :  { %v454_v52 = vmax.f32 %v331_v25, %v444_v50 }
 0x105   :  { %v594_v30 = vmax.f32 %v586_v26, 0.0  ;;  %v416_v12 = vpop.f32.mrf.mxu1 }
 0x106   :  { %v561_v31 = vpop.f32.mrf.mxu2  ;;  %v534_v33 = vpop.f32.mrf.mxu0 }
 0x107   :  { %v872_v53 = vpack.c.bf16 %v594_v30, %v593_v29  ;;  %v562_v4 = vadd.f32 %v561_v31, %v532_v21 }
 0x109   :  { %884 = vst [vmem:[%s1246_s3 + $0x8] sm:$0xff] %v872_v53   ;;  %v575_v39 = vmax.f32 %v452_v35, %v562_v4  ;;  %v445_v15 = vpop.f32.mrf.mxu3 }
 0x10a   :  { %v446_v54 = vadd.f32 %v445_v15, %v416_v12 }
 0x10b   :  { %v587_v43 = vadd.f32 %v1205_v42, %v575_v39 }
 0x10c   :  { %v455_v60 = vmax.f32 %v332_v55, %v446_v54 }
 0x10d   :  { %v595_v49 = vmax.f32 %v587_v43, 0.0 }
 0x10e   :  { %v563_v41 = vpop.f32.mrf.mxu2  ;;  %v537_v46 = vpop.f32.mrf.mxu0 }
 0x10f   :  { %v564_v17 = vadd.f32 %v563_v41, %v534_v33 }
 0x111   :  { %v576_v44 = vmax.f32 %v453_v5, %v564_v17 }
 0x113   :  { %v588_v45 = vadd.f32 %v1205_v42, %v576_v44 }
 0x115   :  { %v596_v0 = vmax.f32 %v588_v45, 0.0 }
 0x116   :  { %v566_v13 = vpop.f32.mrf.mxu2  ;;  %v539_v57 = vpop.f32.mrf.mxu0 }
 0x117   :  { %v877_v9 = vpack.c.bf16 %v596_v0, %v595_v49  ;;  %v567_v48 = vadd.f32 %v566_v13, %v537_v46 }
 0x119   :  { %885 = vst [vmem:[%s1246_s3 + $0x10] sm:$0xff] %v877_v9   ;;  %v577_v56 = vmax.f32 %v454_v52, %v567_v48 }
 0x11b   :  { %v589_v16 = vadd.f32 %v1205_v42, %v577_v56 }
 0x11d   :  { %v597_v63 = vmax.f32 %v589_v16, 0.0 }
 0x11e   :  { %v568_v59 = vpop.f32.mrf.mxu2 }
 0x11f   :  { %v569_v61 = vadd.f32 %v568_v59, %v539_v57 }
 0x121   :  { %v578_v28 = vmax.f32 %v455_v60, %v569_v61 }
 0x123   :  { %v590_v62 = vadd.f32 %v1205_v42, %v578_v28 }
 0x125   :  { %v598_v1 = vmax.f32 %v590_v62, 0.0 }
 0x127   :  { %v882_v2 = vpack.c.bf16 %v598_v1, %v597_v63 }
 0x129   :  { %886 = vst [vmem:[%s1246_s3 + $0x18] sm:$0xff] %v882_v2  }

// kernel: net_forward.5
= control target key start
LH: loop header
LB: loop body
LE: loop exit
PB: predicated region body
PF: predicated region fallthrough
CT: control target
= control target key end

     0   :  { %vm254_vm0 = vcmask 130048   ;;  %s921_s1 = inlined_call_operand.vmem [shape: bf16[400,128], index: 1, kind: input, shape index: {}]   ;;  %s922_s0 = inlined_call_operand.vmem [shape: bf16[16,400], index: 0, kind: input, shape index: {}]   ;;  %s923_s3 = inlined_call_operand.vmem [shape: bf16[128,128], index: 3, kind: input, shape index: {}]   ;;  %s924_s2 = inlined_call_operand.vmem [shape: f32[1,128], index: 2, kind: input, shape index: {}]   ;;  %s925_s4 = inlined_call_operand.vmem [shape: f32[1,128], index: 4, kind: input, shape index: {}]   ;;  %s926_s5 = inlined_call_operand.vmem [shape: bf16[128,128], index: 5, kind: input, shape index: {}]   ;;  %s927_s6 = inlined_call_operand.vmem [shape: f32[1,128], index: 6, kind: input, shape index: {}]   ;;  %s928_s7 = inlined_call_operand.vmem [shape: f32[16,128], index: 7, kind: output, shape index: {}]  }
   0x1   :  { %v682_v0 = vld [vmem:[%s921_s1 + $0x38] sm:$0xff]  ;;  %v681_v3 = vld [vmem:[%s921_s1 + $0x30] sm:$0xff]  ;;  %v680_v6 = vld [vmem:[%s921_s1 + $0x28] sm:$0xff] }
   0x2   :  { %v690_v1 = vld [vmem:[%s921_s1 + $0x78] sm:$0xff]  ;;  %258 = vmatpush.bf16.msra.mxu0 %v682_v0  ;;  %v689_v4 = vld [vmem:[%s921_s1 + $0x70] sm:$0xff]  ;;  %v688_v7 = vld [vmem:[%s921_s1 + $0x68] sm:$0xff] }
   0x3   :  { %v698_v2 = vld [vmem:[%s921_s1 + $0xb8] sm:$0xff]  ;;  %272 = vmatpush.bf16.msra.mxu1 %v690_v1  ;;  %v697_v5 = vld [vmem:[%s921_s1 + $0xb0] sm:$0xff]  ;;  %v699_v8 = vld [vmem:[%s921_s1 + $0xc0] sm:$0xff] }
   0x4   :  { %286 = vmatpush.bf16.msra.mxu2 %v698_v2  ;;  %v696_v9 = vld [vmem:[%s921_s1 + $0xa8] sm:$0xff]  ;;  %v502_v11 = vld [vmem:[%s922_s0 + $0x18] sm:$0xf0]  ;;  %307 = vmatpush.bf16.msra.mxu3 %v699_v8  ;;  %v679_v13 = vld [vmem:[%s921_s1 + $0x20] sm:$0xff] }
   0x5   :  { %v672_v10 = vld [vmem:[%s922_s0 + $0xc] sm:$0xf]  ;;  %v687_v14 = vld [vmem:[%s921_s1 + $0x60] sm:$0xff]  ;;  %v707_v16 = vld [vmem:[%s923_s3 + $0x38] sm:$0xff] }
   0x6   :  { %259 = vmatpush.bf16.msra.mxu0 %v681_v3  ;;  %v505_v12 = vor.u32 %v672_v10, %v502_v11  ;;  %v695_v15 = vld [vmem:[%s921_s1 + $0xa0] sm:$0xff]  ;;  %v706_v17 = vld [vmem:[%s923_s3 + $0x30] sm:$0xff]  ;;  %v678_v18 = vld [vmem:[%s921_s1 + $0x18] sm:$0xff] }
   0x7   :  { %273 = vmatpush.bf16.msra.mxu1 %v689_v4  ;;  %v686_v19 = vld [vmem:[%s921_s1 + $0x58] sm:$0xff]  ;;  %v677_v21 = vld [vmem:[%s921_s1 + $0x10] sm:$0xff]  ;;  %v676_v24 = vld [vmem:[%s921_s1 + $0x8] sm:$0xff] }
   0x8   :  { %287 = vmatpush.bf16.msra.mxu2 %v697_v5  ;;  %606 = vmatmul.msk.bf16.vlgmr.msra.gmra.mxu3 %vm254_vm0, %v505_v12  ;;  %v694_v20 = vld [vmem:[%s921_s1 + $0x98] sm:$0xff]  ;;  %v685_v22 = vld [vmem:[%s921_s1 + $0x50] sm:$0xff]  ;;  %v684_v25 = vld [vmem:[%s921_s1 + $0x48] sm:$0xff] }
   0x9   :  { %385 = vmatpush.bf16.msrb.mxu3 %v707_v16  ;;  %v693_v23 = vld [vmem:[%s921_s1 + $0x90] sm:$0xff]  ;;  %v692_v26 = vld [vmem:[%s921_s1 + $0x88] sm:$0xff]  ;;  %v675_v27 = vld [vmem:[%s921_s1] sm:$0xff] }
   0xa   :  { %260 = vmatpush.bf16.msra.mxu0 %v680_v6  ;;  %v683_v28 = vld [vmem:[%s921_s1 + $0x40] sm:$0xff]  ;;  %v673_v30 = vld [vmem:[%s922_s0 + $0xc] sm:$0xf0]  ;;  %v494_v32 = vld [vmem:[%s922_s0 + $0x10] sm:$0xf0] }
   0xb   :  { %274 = vmatpush.bf16.msra.mxu1 %v688_v7  ;;  %v492_v29 = vld [vmem:[%s922_s0] sm:$0xf]  ;;  %v671_v31 = vld [vmem:[%s922_s0 + $0x4] sm:$0xf]  ;;  %v500_v34 = vld [vmem:[%s922_s0 + $0x8] sm:$0xf] }
   0xc   :  { %288 = vmatpush.bf16.msra.mxu2 %v696_v9  ;;  %v691_v33 = vld [vmem:[%s921_s1 + $0x80] sm:$0xff]  ;;  %v674_v35 = vld [vmem:[%s922_s0 + $0x14] sm:$0xf0]  ;;  %v493_v36 = vor.u32 %v673_v30, %v492_v29  ;;  %v497_v37 = vor.u32 %v671_v31, %v494_v32  ;;  %v705_v39 = vld [vmem:[%s923_s3 + $0x28] sm:$0xff] }
   0xd   :  { %386 = vmatpush.bf16.msrb.mxu3 %v706_v17  ;;  %v501_v38 = vor.u32 %v674_v35, %v500_v34  ;;  %v704_v40 = vld [vmem:[%s923_s3 + $0x20] sm:$0xff]  ;;  %v703_v41 = vld [vmem:[%s923_s3 + $0x18] sm:$0xff]  ;;  %v702_v42 = vld [vmem:[%s923_s3 + $0x10] sm:$0xff] }
   0xe   :  { %261 = vmatpush.bf16.msra.mxu0 %v679_v13  ;;  %v701_v43 = vld [vmem:[%s923_s3 + $0x8] sm:$0xff]  ;;  %v700_v44 = vld [vmem:[%s923_s3] sm:$0xff]  ;;  %v715_v45 = vld [vmem:[%s926_s5 + $0x38] sm:$0xff] }
   0xf   :  { %275 = vmatpush.bf16.msra.mxu1 %v687_v14  ;;  %v714_v46 = vld [vmem:[%s926_s5 + $0x30] sm:$0xff]  ;;  %v713_v47 = vld [vmem:[%s926_s5 + $0x28] sm:$0xff]  ;;  %v716_v48 = vld [vmem:[%s924_s2] ss:$0 sm:$0xff] }
  0x10   :  { %289 = vmatpush.bf16.msra.mxu2 %v695_v15  ;;  %v712_v50 = vld [vmem:[%s926_s5 + $0x20] sm:$0xff]  ;;  %v711_v5 = vld [vmem:[%s926_s5 + $0x18] sm:$0xff]  ;;  %v710_v6 = vld [vmem:[%s926_s5 + $0x10] sm:$0xff] }
  0x11   :  { %387 = vmatpush.bf16.msrb.mxu3 %v705_v39  ;;  %v709_v7 = vld [vmem:[%s926_s5 + $0x8] sm:$0xff]  ;;  %v708_v8 = vld [vmem:[%s926_s5] sm:$0xff] }
  0x12   :  { %262 = vmatpush.bf16.msra.mxu0 %v678_v18  ;;  %v717_v10 = vld [vmem:[%s925_s4] ss:$0 sm:$0xff] }
  0x13   :  { %276 = vmatpush.bf16.msra.mxu1 %v686_v19  ;;  %v718_v17 = vld [vmem:[%s927_s6] ss:$0 sm:$0xff] }
  0x14   :  { %290 = vmatpush.bf16.msra.mxu2 %v694_v20 }
  0x15   :  { %388 = vmatpush.bf16.msrb.mxu3 %v704_v40 }
  0x16   :  { %263 = vmatpush.bf16.msra.mxu0 %v677_v21 }
  0x17   :  { %277 = vmatpush.bf16.msra.mxu1 %v685_v22 }
  0x18   :  { %291 = vmatpush.bf16.msra.mxu2 %v693_v23 }
  0x19   :  { %389 = vmatpush.bf16.msrb.mxu3 %v703_v41 }
  0x1a   :  { %264 = vmatpush.bf16.msra.mxu0 %v676_v24 }
  0x1b   :  { %278 = vmatpush.bf16.msra.mxu1 %v684_v25 }
  0x1c   :  { %292 = vmatpush.bf16.msra.mxu2 %v692_v26 }
  0x1d   :  { %390 = vmatpush.bf16.msrb.mxu3 %v702_v42 }
  0x1e   :  { %265 = vmatpush.bf16.msra.mxu0 %v675_v27 }
  0x1f   :  { %279 = vmatpush.bf16.msra.mxu1 %v683_v28 }
  0x20   :  { %293 = vmatpush.bf16.msra.mxu2 %v691_v33 }
  0x21   :  { %266 = vmatmul.bf16.vlgmr.msra.gmra.mxu0 %v493_v36  ;;  %391 = vmatpush.bf16.msrb.mxu3 %v701_v43 }
  0x22   :  { %280 = vmatmul.bf16.vlgmr.msra.gmra.mxu1 %v497_v37  ;;  %470 = vmatpush.bf16.msrb.mxu0 %v715_v45 }
  0x23   :  { %294 = vmatmul.bf16.vlgmr.msra.gmra.mxu2 %v501_v38 }
  0x25   :  { %392 = vmatpush.bf16.msrb.mxu3 %v700_v44 }
  0x26   :  { %471 = vmatpush.bf16.msrb.mxu0 %v714_v46 }
  0x2a   :  { %472 = vmatpush.bf16.msrb.mxu0 %v713_v47 }
  0x2e   :  { %473 = vmatpush.bf16.msrb.mxu0 %v712_v50 }
  0x32   :  { %474 = vmatpush.bf16.msrb.mxu0 %v711_v5 }
  0x36   :  { %475 = vmatpush.bf16.msrb.mxu0 %v710_v6 }
  0x3a   :  { %476 = vmatpush.bf16.msrb.mxu0 %v709_v7 }
  0x3e   :  { %477 = vmatpush.bf16.msrb.mxu0 %v708_v8 }
  0x8b   :  { %v309_v53 = vpop.f32.mrf.mxu3 }
  0x93   :  { %v311_v0 = vpop.f32.mrf.mxu3 }
  0x9e   :  { %v267_v49 = vpop.f32.mrf.mxu0 }
  0x9f   :  { %v281_v51 = vpop.f32.mrf.mxu1  ;;  %v268_v52 = vadd.f32 %v716_v48, %v267_v49 }
  0xa1   :  { %v282_v55 = vadd.f32 %v281_v51, %v268_v52 }
  0xa6   :  { %v295_v54 = vpop.f32.mrf.mxu2  ;;  %v269_v56 = vpop.f32.mrf.mxu0 }
  0xa7   :  { %v270_v57 = vadd.f32 %v716_v48, %v269_v56  ;;  %v296_v58 = vadd.f32 %v295_v54, %v282_v55  ;;  %v283_v59 = vpop.f32.mrf.mxu1 }
  0xa9   :  { %v284_v60 = vadd.f32 %v283_v59, %v270_v57  ;;  %v310_v62 = vadd.f32 %v309_v53, %v296_v58 }
  0xab   :  { %v314_v2 = vmax.f32 %v310_v62, 0.0 }
  0xae   :  { %v297_v61 = vpop.f32.mrf.mxu2 }
  0xaf   :  { %v298_v63 = vadd.f32 %v297_v61, %v284_v60 }
  0xb1   :  { %v312_v1 = vadd.f32 %v311_v0, %v298_v63 }
  0xb3   :  { %v315_v3 = vmax.f32 %v312_v1, 0.0 }
  0xb5   :  { %v316_v4 = vpack.c.bf16 %v315_v3, %v314_v2 }
  0xb7   :  { %393 = vmatmul.bf16.vlgmr.msrb.gmra.mxu3 %v316_v4 }
 0x13a   :  { %v394_v9 = vpop.f32.mrf.mxu3 }
 0x13b   :  { %v395_v11 = vadd.f32 %v717_v10, %v394_v9 }
 0x13d   :  { %v399_v14 = vmax.f32 %v395_v11, 0.0 }
 0x142   :  { %v396_v12 = vpop.f32.mrf.mxu3 }
 0x143   :  { %v397_v13 = vadd.f32 %v717_v10, %v396_v12 }
 0x145   :  { %v400_v15 = vmax.f32 %v397_v13, 0.0 }
 0x147   :  { %v401_v16 = vpack.c.bf16 %v400_v15, %v399_v14 }
 0x149   :  { %478 = vmatmul.bf16.vlgmr.msrb.gmra.mxu0 %v401_v16 }
 0x1c6   :  { %v479_v18 = vpop.f32.mrf.mxu0 }
 0x1c7   :  { %v480_v19 = vadd.f32 %v718_v17, %v479_v18 }
 0x1c9   :  { %484 = vst [vmem:[%s928_s7] sm:$0xff] %v480_v19 }
 0x1ce   :  { %v481_v20 = vpop.f32.mrf.mxu0 }
 0x1cf   :  { %v482_v21 = vadd.f32 %v718_v17, %v481_v20 }
 0x1d1   :  { %485 = vst [vmem:[%s928_s7 + $0x8] sm:$0xff] %v482_v21 }

</bundles_post_ra>
